<compile_context>
chip_gen: v7x
topology: tpu7x:2x2x1
jax: 0.10.0
libtpu: 0.0.40
codegen_flags: <defaults>
</compile_context>

<pallas_src>
import jax
import jax.numpy as jnp
from jax.experimental import pallas as pl
from jax.experimental.pallas import tpu as pltpu

C_UNIT = 8  # f32 sublane tile


def _round_up(x, m):
    return ((x + m - 1) // m) * m


# ----------------------------------------------------------------------------
# Fused kernel builder
# ----------------------------------------------------------------------------
def _make_fused_head_kernel(*, W, K, dil, n_layers, num_classes, use_softmax,
                            n_lanes, compute_dtype):
    """One grid step == one batch tile of `n_lanes` (= images_per_step * H*W)
    lanes.  The whole head -- channel concat, (conv+ReLU)^(n-1), conv,
    channel softmax -- runs in VMEM/vregs.  Each conv is a SINGLE MXU matmul
    on an im2col slab built with XLU lane rolls + precomputed validity masks."""
    ph = (dil * (K - 1)) // 2
    taps = [(kh * dil - ph, kw * dil - ph) for kh in range(K) for kw in range(K)]
    shifts = [(-(dh * W + dw)) % n_lanes for dh, dw in taps]

    def kernel(f_ref, z_ref, m_ref, *rest):
        layer_refs = rest[:2 * n_layers]          # (w_mat, bias) pairs
        o_ref = rest[2 * n_layers]                # (Cout_pad, n_lanes)

        # Pre-broadcast (8, n_lanes) validity masks, one per non-center tap.
        masks = {t: m_ref[t] for t, (dh, dw) in enumerate(taps)
                 if not (dh == 0 and dw == 0)}

        def split8(a):
            return [a[g * C_UNIT:(g + 1) * C_UNIT]
                    for g in range(a.shape[0] // C_UNIT)]

        # Layer-0 input: feature groups ++ latent groups (channel concat of
        # whole 8-row sublane tiles -> no relayout).
        x_groups = split8(f_ref[...]) + split8(z_ref[...])

        for li in range(n_layers):
            w_ref = layer_refs[2 * li]            # (Cout_pad, K*K*Cin_pad)
            b_ref = layer_refs[2 * li + 1]        # (Cout_pad, 1)

            # im2col slab: tap-major, then 8-row channel groups.
            pieces = []
            for t, (dh, dw) in enumerate(taps):
                for g in x_groups:
                    gs = g if shifts[t] == 0 else pltpu.roll(g, shifts[t], axis=1)
                    pieces.append(gs if (dh == 0 and dw == 0) else gs * masks[t])
            x_col = jnp.concatenate(pieces, axis=0)          # (K*K*Cin_pad, N)

            lhs = w_ref[...]
            rhs = x_col
            if compute_dtype != jnp.float32:                 # bf16 MXU operands
                lhs = lhs.astype(compute_dtype)
                rhs = rhs.astype(compute_dtype)
            acc = jnp.dot(lhs, rhs,
                          preferred_element_type=jnp.float32) + b_ref[...]

            if li < n_layers - 1:
                x_groups = split8(jnp.maximum(acc, 0.0))     # ReLU
            else:
                if use_softmax:
                    # Channel softmax over the REAL classes only (padded rows
                    # carry zero weights/bias and are sliced off by wrapper).
                    m = jnp.max(acc[:num_classes], axis=0, keepdims=True)
                    e = jnp.exp(acc - m)
                    d = jnp.sum(e[:num_classes], axis=0, keepdims=True)
                    r = pl.reciprocal(d, approx=True)
                    r = r * (2.0 - d * r)                    # Newton -> ~exact
                    acc = e * r
                o_ref[...] = acc.astype(o_ref.dtype)

    return kernel


# ----------------------------------------------------------------------------
# One-time parameter packing (hoists transpose/padding out of the forward path)
# ----------------------------------------------------------------------------
def prepare_pionono_head_params(params_hwio, latent_dim):
    """params_hwio: list of (w (KH,KW,Cin,Cout), bias (Cout,)).
    Packs each conv ONCE into the padded matmul layout used by the kernel:
    weight (Cout_pad, KH*KW*Cin_pad) with zero rows/cols on padded channels,
    bias (Cout_pad, 1)."""
    packed = []
    for li, (w, b) in enumerate(params_hwio):
        KH, KW, cin, cout = w.shape
        group_sizes = [cin - latent_dim, latent_dim] if li == 0 else [cin]
        blocks, start = [], 0
        for gsz in group_sizes:                      # pad each channel group to 8
            wg = w[:, :, start:start + gsz, :]
            wg = jnp.pad(wg, ((0, 0), (0, 0),
                              (0, _round_up(gsz, C_UNIT) - gsz), (0, 0)))
            blocks.append(wg)
            start += gsz
        wp = jnp.concatenate(blocks, axis=2) if len(blocks) > 1 else blocks[0]
        cin_pad = wp.shape[2]
        cout_pad = _round_up(cout, C_UNIT)
        wp = jnp.pad(wp, ((0, 0), (0, 0), (0, 0), (0, cout_pad - cout)))
        w_mat = wp.reshape(KH * KW * cin_pad, cout_pad).T.astype(jnp.float32)
        b_col = jnp.pad(b, (0, cout_pad - cout)).reshape(cout_pad, 1)
        packed.append((w_mat, b_col.astype(jnp.float32)))
    return {"layers": packed,
            "num_classes": int(params_hwio[-1][0].shape[-1]),
            "kernel_size": int(params_hwio[0][0].shape[0])}


# ----------------------------------------------------------------------------
# Forward pass (PyTorch semantics: NCHW in, NCHW out)
# ----------------------------------------------------------------------------
def pionono_head_forward(feature_map_nchw, z, prepared, *, head_dilation=1,
                         use_softmax=True, images_per_step=None,
                         compute_dtype=jnp.float32, core_parallel=False):
    """feature_map_nchw: (B, F, H, W); z: (B, latent_dim).  Returns
    (B, num_classes, H, W), same semantics as PiononoHead.forward."""
    B, F, H, W = feature_map_nchw.shape
    L = z.shape[1]
    S = H * W
    layers = prepared["layers"]
    n_layers = len(layers)
    K = prepared["kernel_size"]
    num_classes = prepared["num_classes"]
    F_pad = _round_up(F, C_UNIT)
    L_pad = _round_up(L, C_UNIT)
    cout_pad = layers[-1][0].shape[0]

    if images_per_step is None:
        # Fold the whole batch into one lane-dense grid step while tiny.
        images_per_step = B if B * S <= 4096 else 1
    assert B % images_per_step == 0
    steps = B // images_per_step
    N = images_per_step * S
    assert N % 128 == 0, "batch-tile lane width must be a multiple of 128"

    # (B,F,H,W) -> (F_pad, B*S): channels on sublanes, batch*spatial on lanes.
    f = feature_map_nchw.reshape(B, F, S).astype(jnp.float32)
    f = jnp.transpose(f, (1, 0, 2)).reshape(F, B * S)
    f = jnp.pad(f, ((0, F_pad - F), (0, 0)))

    # z -> (L_pad, B*S): each image's latent broadcast over its S lanes.
    zt = jnp.pad(z.astype(jnp.float32).T, ((0, L_pad - L), (0, 0)))
    zb = jnp.broadcast_to(zt[:, :, None], (L_pad, B, S)).reshape(L_pad, B * S)

    # 'same'-padding validity masks: precomputed once, pre-broadcast to the
    # 8-row sublane group -> (n_taps, 8, N).  Identical for every batch tile.
    ph = (head_dilation * (K - 1)) // 2
    taps = [(kh * head_dilation - ph, kw * head_dilation - ph)
            for kh in range(K) for kw in range(K)]
    lin = jnp.arange(S, dtype=jnp.int32)
    hh, ww = lin // W, lin % W
    mask_rows = [((hh + dh >= 0) & (hh + dh < H) &
                  (ww + dw >= 0) & (ww + dw < W)).astype(jnp.float32)
                 for dh, dw in taps]
    masks = jnp.tile(jnp.stack(mask_rows), (1, images_per_step))      # (taps, N)
    masks = jnp.broadcast_to(masks[:, None, :], (len(taps), C_UNIT, N))

    inputs = [f, zb, masks]
    in_specs = [pl.BlockSpec((F_pad, N), lambda i: (0, i)),
                pl.BlockSpec((L_pad, N), lambda i: (0, i)),
                pl.BlockSpec((len(taps), C_UNIT, N), lambda i: (0, 0, 0))]
    flops = 0
    for w_mat, b_col in layers:
        inputs += [w_mat, b_col]
        in_specs += [pl.BlockSpec(w_mat.shape, lambda i: (0, 0)),
                     pl.BlockSpec(b_col.shape, lambda i: (0, 0))]
        flops += 2 * B * S * w_mat.shape[0] * w_mat.shape[1]
    bytes_accessed = 4 * (f.size + zb.size + masks.size + cout_pad * B * S
                          + sum(w.size + b.size for w, b in layers))

    kernel = _make_fused_head_kernel(
        W=W, K=K, dil=head_dilation, n_layers=n_layers,
        num_classes=num_classes, use_softmax=use_softmax,
        n_lanes=N, compute_dtype=compute_dtype)

    # TODO(synk): flip core_parallel on by default on v7x once trace-verified
    # that both TensorCores are fed (plain "parallel" may serialize on one TC).
    sem = (pltpu.CORE_PARALLEL if core_parallel else "parallel",)

    out = pl.pallas_call(
        kernel,
        out_shape=jax.ShapeDtypeStruct((cout_pad, B * S), jnp.float32),
        grid_spec=pltpu.PrefetchScalarGridSpec(
            num_scalar_prefetch=0,
            grid=(steps,),
            in_specs=in_specs,
            out_specs=pl.BlockSpec((cout_pad, N), lambda i: (0, i))),
        compiler_params=pltpu.CompilerParams(
            dimension_semantics=sem,
            vmem_limit_bytes=32 * 1024 * 1024),
        cost_estimate=pl.CostEstimate(
            flops=flops,
            transcendentals=(B * S * cout_pad) if use_softmax else 0,
            bytes_accessed=bytes_accessed),
    )(*inputs)

    # (Cout_pad, B*S) -> NCHW, drop padded classes.
    out = jnp.transpose(out.reshape(cout_pad, B, S), (1, 0, 2))[:, :num_classes]
    return out.reshape(B, num_classes, H, W)


# ----------------------------------------------------------------------------
# Parameter construction (deterministic Xavier-uniform, zero bias; HWIO)
# ----------------------------------------------------------------------------
def _xavier_conv(key, kh, kw, cin, cout):
    fan_in = cin * kh * kw
    fan_out = cout * kh * kw
    bound = (6.0 / (fan_in + fan_out)) ** 0.5
    w = jax.random.uniform(key, (kh, kw, cin, cout), jnp.float32,
                           minval=-bound, maxval=bound)
    return w, jnp.zeros((cout,), jnp.float32)


def make_pionono_head_params(key, num_filters_last_layer, latent_dim,
                             num_classes, no_convs_fcomb, head_kernelsize):
    k = head_kernelsize
    F = num_filters_last_layer
    keys = jax.random.split(key, no_convs_fcomb)
    params = [_xavier_conv(keys[0], k, k, F + latent_dim, F)]    # first + ReLU
    for i in range(no_convs_fcomb - 2):                          # mids + ReLU
        params.append(_xavier_conv(keys[1 + i], k, k, F, F))
    params.append(_xavier_conv(keys[-1], k, k, F, num_classes))  # last layer
    return params


# ----------------------------------------------------------------------------
# Pure-JAX reference (same module semantics) for validation
# ----------------------------------------------------------------------------
def _reference_forward(feature_map, z, params, *, head_dilation, use_softmax):
    B, F, H, W = feature_map.shape
    L = z.shape[1]
    z_t = jnp.broadcast_to(z[:, :, None, None], (B, L, H, W))
    x = jnp.concatenate([feature_map, z_t], axis=1).astype(jnp.float32)
    n = len(params)
    for i, (w, b) in enumerate(params):
        y = jax.lax.conv_general_dilated(
            x, w, window_strides=(1, 1), padding='SAME',
            rhs_dilation=(head_dilation, head_dilation),
            dimension_numbers=('NCHW', 'HWIO', 'NCHW'))
        y = y + b[None, :, None, None]
        if i < n - 1:
            x = jnp.maximum(y, 0.0)
        else:
            x = jax.nn.softmax(y, axis=1) if use_softmax else y
    return x


# ----------------------------------------------------------------------------
if __name__ == "__main__":
    # Module hyper-parameters (small, consistent with PiononoHead.__init__)
    num_filters_last_layer = 4
    latent_dim = 4
    num_classes = 4
    no_convs_fcomb = 3
    head_kernelsize = 3
    head_dilation = 1
    B, H, W = 2, 16, 16

    key = jax.random.PRNGKey(0)
    k_feat, k_z, k_params = jax.random.split(key, 3)

    feature_map = jax.random.normal(
        k_feat, (B, num_filters_last_layer, H, W), jnp.float32)     # NCHW
    z = jax.random.normal(k_z, (B, latent_dim), jnp.float32)

    params = make_pionono_head_params(
        k_params, num_filters_last_layer, latent_dim, num_classes,
        no_convs_fcomb, head_kernelsize)
    prepared = prepare_pionono_head_params(params, latent_dim)       # packed once

    y_ref = _reference_forward(feature_map, z, params,
                               head_dilation=head_dilation, use_softmax=True)

    # 1) f32 matmuls, whole batch folded into one grid step (grid=(1,), N=B*S).
    y = pionono_head_forward(feature_map, z, prepared,
                             head_dilation=head_dilation, use_softmax=True)
    y = jax.block_until_ready(y)
    assert y.shape == (B, num_classes, H, W), y.shape

    ch_sum = jnp.sum(y, axis=1)                      # softmax channels sum to 1
    assert jnp.allclose(ch_sum, jnp.ones_like(ch_sum), atol=1e-3), (
        float(jnp.max(jnp.abs(ch_sum - 1.0))))
    err_f32 = float(jnp.max(jnp.abs(y - y_ref)))
    assert err_f32 < 2e-3, err_f32

    # 2) bf16 MXU operands (v6e/v7x fast path) + one image per grid step
    #    (exercises the multi-step, lane-tiled grid path).
    y_bf16 = pionono_head_forward(feature_map, z, prepared,
                                  head_dilation=head_dilation, use_softmax=True,
                                  images_per_step=1,
                                  compute_dtype=jnp.bfloat16)
    y_bf16 = jax.block_until_ready(y_bf16)
    err_bf16 = float(jnp.max(jnp.abs(y_bf16 - y_ref)))
    assert err_bf16 < 5e-2, err_bf16

    print("KERNEL_OK")
</pallas_src>

<mosaic_0001>
module attributes {stable_mosaic.version = 11 : i64} {
  func.func @kernel(%arg0: i32, %arg1: memref<8x512xf32, #tpu.memory_space<vmem>>, %arg2: memref<8x512xf32, #tpu.memory_space<vmem>>, %arg3: memref<9x8x512xf32, #tpu.memory_space<vmem>>, %arg4: memref<8x144xf32, #tpu.memory_space<vmem>>, %arg5: memref<8x1xf32, #tpu.memory_space<vmem>>, %arg6: memref<8x72xf32, #tpu.memory_space<vmem>>, %arg7: memref<8x1xf32, #tpu.memory_space<vmem>>, %arg8: memref<8x72xf32, #tpu.memory_space<vmem>>, %arg9: memref<8x1xf32, #tpu.memory_space<vmem>>, %arg10: memref<8x512xf32, #tpu.memory_space<vmem>>) attributes {dimension_semantics = [#tpu.dimension_semantics<parallel>], iteration_bounds = array<i64: 1>, scalar_prefetch = 0 : i64, scratch_operands = 0 : i64, tpu.core_type = #tpu.core_type<tc>, window_params = [{transform_indices = @transform_0, window_bounds = array<i64: 8, 512>}, {transform_indices = @transform_1, window_bounds = array<i64: 8, 512>}, {pipeline_mode = #tpu.pipeline_mode<synchronous>, transform_indices = @transform_2, window_bounds = array<i64: 9, 8, 512>}, {pipeline_mode = #tpu.pipeline_mode<synchronous>, transform_indices = @transform_3, window_bounds = array<i64: 8, 144>}, {pipeline_mode = #tpu.pipeline_mode<synchronous>, transform_indices = @transform_4, window_bounds = array<i64: 8, 1>}, {pipeline_mode = #tpu.pipeline_mode<synchronous>, transform_indices = @transform_5, window_bounds = array<i64: 8, 72>}, {pipeline_mode = #tpu.pipeline_mode<synchronous>, transform_indices = @transform_6, window_bounds = array<i64: 8, 1>}, {pipeline_mode = #tpu.pipeline_mode<synchronous>, transform_indices = @transform_7, window_bounds = array<i64: 8, 72>}, {pipeline_mode = #tpu.pipeline_mode<synchronous>, transform_indices = @transform_8, window_bounds = array<i64: 8, 1>}, {transform_indices = @transform_9, window_bounds = array<i64: 8, 512>}]} {
    %c0 = arith.constant 0 : index
    %c0_0 = arith.constant 0 : index
    %c0_1 = arith.constant 0 : index
    %0 = vector.load %arg3[%c0, %c0_0, %c0_1] : memref<9x8x512xf32, #tpu.memory_space<vmem>>, vector<1x8x512xf32>
    %1 = vector.shape_cast %0 : vector<1x8x512xf32> to vector<8x512xf32>
    %c1 = arith.constant 1 : index
    %c0_2 = arith.constant 0 : index
    %c0_3 = arith.constant 0 : index
    %2 = vector.load %arg3[%c1, %c0_2, %c0_3] : memref<9x8x512xf32, #tpu.memory_space<vmem>>, vector<1x8x512xf32>
    %3 = vector.shape_cast %2 : vector<1x8x512xf32> to vector<8x512xf32>
    %c2 = arith.constant 2 : index
    %c0_4 = arith.constant 0 : index
    %c0_5 = arith.constant 0 : index
    %4 = vector.load %arg3[%c2, %c0_4, %c0_5] : memref<9x8x512xf32, #tpu.memory_space<vmem>>, vector<1x8x512xf32>
    %5 = vector.shape_cast %4 : vector<1x8x512xf32> to vector<8x512xf32>
    %c3 = arith.constant 3 : index
    %c0_6 = arith.constant 0 : index
    %c0_7 = arith.constant 0 : index
    %6 = vector.load %arg3[%c3, %c0_6, %c0_7] : memref<9x8x512xf32, #tpu.memory_space<vmem>>, vector<1x8x512xf32>
    %7 = vector.shape_cast %6 : vector<1x8x512xf32> to vector<8x512xf32>
    %c5 = arith.constant 5 : index
    %c0_8 = arith.constant 0 : index
    %c0_9 = arith.constant 0 : index
    %8 = vector.load %arg3[%c5, %c0_8, %c0_9] : memref<9x8x512xf32, #tpu.memory_space<vmem>>, vector<1x8x512xf32>
    %9 = vector.shape_cast %8 : vector<1x8x512xf32> to vector<8x512xf32>
    %c6 = arith.constant 6 : index
    %c0_10 = arith.constant 0 : index
    %c0_11 = arith.constant 0 : index
    %10 = vector.load %arg3[%c6, %c0_10, %c0_11] : memref<9x8x512xf32, #tpu.memory_space<vmem>>, vector<1x8x512xf32>
    %11 = vector.shape_cast %10 : vector<1x8x512xf32> to vector<8x512xf32>
    %c7 = arith.constant 7 : index
    %c0_12 = arith.constant 0 : index
    %c0_13 = arith.constant 0 : index
    %12 = vector.load %arg3[%c7, %c0_12, %c0_13] : memref<9x8x512xf32, #tpu.memory_space<vmem>>, vector<1x8x512xf32>
    %13 = vector.shape_cast %12 : vector<1x8x512xf32> to vector<8x512xf32>
    %c8 = arith.constant 8 : index
    %c0_14 = arith.constant 0 : index
    %c0_15 = arith.constant 0 : index
    %14 = vector.load %arg3[%c8, %c0_14, %c0_15] : memref<9x8x512xf32, #tpu.memory_space<vmem>>, vector<1x8x512xf32>
    %15 = vector.shape_cast %14 : vector<1x8x512xf32> to vector<8x512xf32>
    %c0_16 = arith.constant 0 : index
    %c0_17 = arith.constant 0 : index
    %16 = vector.load %arg1[%c0_16, %c0_17] : memref<8x512xf32, #tpu.memory_space<vmem>>, vector<8x512xf32>
    %c0_18 = arith.constant 0 : index
    %c0_19 = arith.constant 0 : index
    %17 = vector.load %arg2[%c0_18, %c0_19] : memref<8x512xf32, #tpu.memory_space<vmem>>, vector<8x512xf32>
    %c17_i32 = arith.constant 17 : i32
    %18 = tpu.dynamic_rotate %16 by %c17_i32 dim 1 : vector<8x512xf32>, i32 -> vector<8x512xf32>
    %19 = arith.mulf %18, %1 : vector<8x512xf32>
    %c17_i32_20 = arith.constant 17 : i32
    %20 = tpu.dynamic_rotate %17 by %c17_i32_20 dim 1 : vector<8x512xf32>, i32 -> vector<8x512xf32>
    %21 = arith.mulf %20, %1 : vector<8x512xf32>
    %c16_i32 = arith.constant 16 : i32
    %22 = tpu.dynamic_rotate %16 by %c16_i32 dim 1 : vector<8x512xf32>, i32 -> vector<8x512xf32>
    %23 = arith.mulf %22, %3 : vector<8x512xf32>
    %c16_i32_21 = arith.constant 16 : i32
    %24 = tpu.dynamic_rotate %17 by %c16_i32_21 dim 1 : vector<8x512xf32>, i32 -> vector<8x512xf32>
    %25 = arith.mulf %24, %3 : vector<8x512xf32>
    %c15_i32 = arith.constant 15 : i32
    %26 = tpu.dynamic_rotate %16 by %c15_i32 dim 1 : vector<8x512xf32>, i32 -> vector<8x512xf32>
    %27 = arith.mulf %26, %5 : vector<8x512xf32>
    %c15_i32_22 = arith.constant 15 : i32
    %28 = tpu.dynamic_rotate %17 by %c15_i32_22 dim 1 : vector<8x512xf32>, i32 -> vector<8x512xf32>
    %29 = arith.mulf %28, %5 : vector<8x512xf32>
    %c1_i32 = arith.constant 1 : i32
    %30 = tpu.dynamic_rotate %16 by %c1_i32 dim 1 : vector<8x512xf32>, i32 -> vector<8x512xf32>
    %31 = arith.mulf %30, %7 : vector<8x512xf32>
    %c1_i32_23 = arith.constant 1 : i32
    %32 = tpu.dynamic_rotate %17 by %c1_i32_23 dim 1 : vector<8x512xf32>, i32 -> vector<8x512xf32>
    %33 = arith.mulf %32, %7 : vector<8x512xf32>
    %c511_i32 = arith.constant 511 : i32
    %34 = tpu.dynamic_rotate %16 by %c511_i32 dim 1 : vector<8x512xf32>, i32 -> vector<8x512xf32>
    %35 = arith.mulf %34, %9 : vector<8x512xf32>
    %c511_i32_24 = arith.constant 511 : i32
    %36 = tpu.dynamic_rotate %17 by %c511_i32_24 dim 1 : vector<8x512xf32>, i32 -> vector<8x512xf32>
    %37 = arith.mulf %36, %9 : vector<8x512xf32>
    %c497_i32 = arith.constant 497 : i32
    %38 = tpu.dynamic_rotate %16 by %c497_i32 dim 1 : vector<8x512xf32>, i32 -> vector<8x512xf32>
    %39 = arith.mulf %38, %11 : vector<8x512xf32>
    %c497_i32_25 = arith.constant 497 : i32
    %40 = tpu.dynamic_rotate %17 by %c497_i32_25 dim 1 : vector<8x512xf32>, i32 -> vector<8x512xf32>
    %41 = arith.mulf %40, %11 : vector<8x512xf32>
    %c496_i32 = arith.constant 496 : i32
    %42 = tpu.dynamic_rotate %16 by %c496_i32 dim 1 : vector<8x512xf32>, i32 -> vector<8x512xf32>
    %43 = arith.mulf %42, %13 : vector<8x512xf32>
    %c496_i32_26 = arith.constant 496 : i32
    %44 = tpu.dynamic_rotate %17 by %c496_i32_26 dim 1 : vector<8x512xf32>, i32 -> vector<8x512xf32>
    %45 = arith.mulf %44, %13 : vector<8x512xf32>
    %c495_i32 = arith.constant 495 : i32
    %46 = tpu.dynamic_rotate %16 by %c495_i32 dim 1 : vector<8x512xf32>, i32 -> vector<8x512xf32>
    %47 = arith.mulf %46, %15 : vector<8x512xf32>
    %c495_i32_27 = arith.constant 495 : i32
    %48 = tpu.dynamic_rotate %17 by %c495_i32_27 dim 1 : vector<8x512xf32>, i32 -> vector<8x512xf32>
    %49 = arith.mulf %48, %15 : vector<8x512xf32>
    %50 = tpu.concatenate %19, %21, %23, %25, %27, %29, %31, %33, %16, %17, %35, %37, %39, %41, %43, %45 in 0 : vector<8x512xf32>, vector<8x512xf32>, vector<8x512xf32>, vector<8x512xf32>, vector<8x512xf32>, vector<8x512xf32>, vector<8x512xf32>, vector<8x512xf32>, vector<8x512xf32>, vector<8x512xf32>, vector<8x512xf32>, vector<8x512xf32>, vector<8x512xf32>, vector<8x512xf32>, vector<8x512xf32>, vector<8x512xf32> -> vector<128x512xf32>
    %51 = tpu.concatenate %47, %49 in 0 : vector<8x512xf32>, vector<8x512xf32> -> vector<16x512xf32>
    %52 = tpu.concatenate %50, %51 in 0 : vector<128x512xf32>, vector<16x512xf32> -> vector<144x512xf32>
    %c0_28 = arith.constant 0 : index
    %c0_29 = arith.constant 0 : index
    %53 = vector.load %arg4[%c0_28, %c0_29] : memref<8x144xf32, #tpu.memory_space<vmem>>, vector<8x144xf32>
    %cst = arith.constant dense<0.000000e+00> : vector<8x512xf32>
    %54 = tpu.matmul %53, %52, %cst {dimension_numbers = #tpu.dot_dimension_numbers<[1], [0], [0], [1], [0, 0, 1, 1], [], []>} : vector<8x144xf32>, vector<144x512xf32>, vector<8x512xf32> -> vector<8x512xf32>
    %c0_30 = arith.constant 0 : index
    %c0_31 = arith.constant 0 : index
    %55 = vector.load %arg5[%c0_30, %c0_31] : memref<8x1xf32, #tpu.memory_space<vmem>>, vector<8x1xf32>
    %56 = vector.broadcast %55 : vector<8x1xf32> to vector<8x512xf32>
    %57 = arith.addf %54, %56 : vector<8x512xf32>
    %cst_32 = arith.constant 0.000000e+00 : f32
    %58 = vector.broadcast %cst_32 : f32 to vector<8x512xf32>
    %59 = arith.maximumf %57, %58 : vector<8x512xf32>
    %c17_i32_33 = arith.constant 17 : i32
    %60 = tpu.dynamic_rotate %59 by %c17_i32_33 dim 1 : vector<8x512xf32>, i32 -> vector<8x512xf32>
    %61 = arith.mulf %60, %1 : vector<8x512xf32>
    %c16_i32_34 = arith.constant 16 : i32
    %62 = tpu.dynamic_rotate %59 by %c16_i32_34 dim 1 : vector<8x512xf32>, i32 -> vector<8x512xf32>
    %63 = arith.mulf %62, %3 : vector<8x512xf32>
    %c15_i32_35 = arith.constant 15 : i32
    %64 = tpu.dynamic_rotate %59 by %c15_i32_35 dim 1 : vector<8x512xf32>, i32 -> vector<8x512xf32>
    %65 = arith.mulf %64, %5 : vector<8x512xf32>
    %c1_i32_36 = arith.constant 1 : i32
    %66 = tpu.dynamic_rotate %59 by %c1_i32_36 dim 1 : vector<8x512xf32>, i32 -> vector<8x512xf32>
    %67 = arith.mulf %66, %7 : vector<8x512xf32>
    %c511_i32_37 = arith.constant 511 : i32
    %68 = tpu.dynamic_rotate %59 by %c511_i32_37 dim 1 : vector<8x512xf32>, i32 -> vector<8x512xf32>
    %69 = arith.mulf %68, %9 : vector<8x512xf32>
    %c497_i32_38 = arith.constant 497 : i32
    %70 = tpu.dynamic_rotate %59 by %c497_i32_38 dim 1 : vector<8x512xf32>, i32 -> vector<8x512xf32>
    %71 = arith.mulf %70, %11 : vector<8x512xf32>
    %c496_i32_39 = arith.constant 496 : i32
    %72 = tpu.dynamic_rotate %59 by %c496_i32_39 dim 1 : vector<8x512xf32>, i32 -> vector<8x512xf32>
    %73 = arith.mulf %72, %13 : vector<8x512xf32>
    %c495_i32_40 = arith.constant 495 : i32
    %74 = tpu.dynamic_rotate %59 by %c495_i32_40 dim 1 : vector<8x512xf32>, i32 -> vector<8x512xf32>
    %75 = arith.mulf %74, %15 : vector<8x512xf32>
    %76 = tpu.concatenate %61, %63, %65, %67, %59, %69, %71, %73, %75 in 0 : vector<8x512xf32>, vector<8x512xf32>, vector<8x512xf32>, vector<8x512xf32>, vector<8x512xf32>, vector<8x512xf32>, vector<8x512xf32>, vector<8x512xf32>, vector<8x512xf32> -> vector<72x512xf32>
    %c0_41 = arith.constant 0 : index
    %c0_42 = arith.constant 0 : index
    %77 = vector.load %arg6[%c0_41, %c0_42] : memref<8x72xf32, #tpu.memory_space<vmem>>, vector<8x72xf32>
    %cst_43 = arith.constant dense<0.000000e+00> : vector<8x512xf32>
    %78 = tpu.matmul %77, %76, %cst_43 {dimension_numbers = #tpu.dot_dimension_numbers<[1], [0], [0], [1], [0, 0, 1, 1], [], []>} : vector<8x72xf32>, vector<72x512xf32>, vector<8x512xf32> -> vector<8x512xf32>
    %c0_44 = arith.constant 0 : index
    %c0_45 = arith.constant 0 : index
    %79 = vector.load %arg7[%c0_44, %c0_45] : memref<8x1xf32, #tpu.memory_space<vmem>>, vector<8x1xf32>
    %80 = vector.broadcast %79 : vector<8x1xf32> to vector<8x512xf32>
    %81 = arith.addf %78, %80 : vector<8x512xf32>
    %cst_46 = arith.constant 0.000000e+00 : f32
    %82 = vector.broadcast %cst_46 : f32 to vector<8x512xf32>
    %83 = arith.maximumf %81, %82 : vector<8x512xf32>
    %c17_i32_47 = arith.constant 17 : i32
    %84 = tpu.dynamic_rotate %83 by %c17_i32_47 dim 1 : vector<8x512xf32>, i32 -> vector<8x512xf32>
    %85 = arith.mulf %84, %1 : vector<8x512xf32>
    %c16_i32_48 = arith.constant 16 : i32
    %86 = tpu.dynamic_rotate %83 by %c16_i32_48 dim 1 : vector<8x512xf32>, i32 -> vector<8x512xf32>
    %87 = arith.mulf %86, %3 : vector<8x512xf32>
    %c15_i32_49 = arith.constant 15 : i32
    %88 = tpu.dynamic_rotate %83 by %c15_i32_49 dim 1 : vector<8x512xf32>, i32 -> vector<8x512xf32>
    %89 = arith.mulf %88, %5 : vector<8x512xf32>
    %c1_i32_50 = arith.constant 1 : i32
    %90 = tpu.dynamic_rotate %83 by %c1_i32_50 dim 1 : vector<8x512xf32>, i32 -> vector<8x512xf32>
    %91 = arith.mulf %90, %7 : vector<8x512xf32>
    %c511_i32_51 = arith.constant 511 : i32
    %92 = tpu.dynamic_rotate %83 by %c511_i32_51 dim 1 : vector<8x512xf32>, i32 -> vector<8x512xf32>
    %93 = arith.mulf %92, %9 : vector<8x512xf32>
    %c497_i32_52 = arith.constant 497 : i32
    %94 = tpu.dynamic_rotate %83 by %c497_i32_52 dim 1 : vector<8x512xf32>, i32 -> vector<8x512xf32>
    %95 = arith.mulf %94, %11 : vector<8x512xf32>
    %c496_i32_53 = arith.constant 496 : i32
    %96 = tpu.dynamic_rotate %83 by %c496_i32_53 dim 1 : vector<8x512xf32>, i32 -> vector<8x512xf32>
    %97 = arith.mulf %96, %13 : vector<8x512xf32>
    %c495_i32_54 = arith.constant 495 : i32
    %98 = tpu.dynamic_rotate %83 by %c495_i32_54 dim 1 : vector<8x512xf32>, i32 -> vector<8x512xf32>
    %99 = arith.mulf %98, %15 : vector<8x512xf32>
    %100 = tpu.concatenate %85, %87, %89, %91, %83, %93, %95, %97, %99 in 0 : vector<8x512xf32>, vector<8x512xf32>, vector<8x512xf32>, vector<8x512xf32>, vector<8x512xf32>, vector<8x512xf32>, vector<8x512xf32>, vector<8x512xf32>, vector<8x512xf32> -> vector<72x512xf32>
    %c0_55 = arith.constant 0 : index
    %c0_56 = arith.constant 0 : index
    %101 = vector.load %arg8[%c0_55, %c0_56] : memref<8x72xf32, #tpu.memory_space<vmem>>, vector<8x72xf32>
    %cst_57 = arith.constant dense<0.000000e+00> : vector<8x512xf32>
    %102 = tpu.matmul %101, %100, %cst_57 {dimension_numbers = #tpu.dot_dimension_numbers<[1], [0], [0], [1], [0, 0, 1, 1], [], []>} : vector<8x72xf32>, vector<72x512xf32>, vector<8x512xf32> -> vector<8x512xf32>
    %c0_58 = arith.constant 0 : index
    %c0_59 = arith.constant 0 : index
    %103 = vector.load %arg9[%c0_58, %c0_59] : memref<8x1xf32, #tpu.memory_space<vmem>>, vector<8x1xf32>
    %104 = vector.broadcast %103 : vector<8x1xf32> to vector<8x512xf32>
    %105 = arith.addf %102, %104 : vector<8x512xf32>
    %106 = vector.extract_strided_slice %105 {offsets = [0, 0], sizes = [4, 512], strides = [1, 1]} : vector<8x512xf32> to vector<4x512xf32>
    %cst_60 = arith.constant dense<0xFF800000> : vector<512xf32>
    %107 = vector.multi_reduction <maximumf>, %106, %cst_60 [0] : vector<4x512xf32> to vector<512xf32>
    %108 = vector.shape_cast %107 : vector<512xf32> to vector<1x512xf32>
    %109 = vector.broadcast %108 : vector<1x512xf32> to vector<8x512xf32>
    %110 = arith.subf %105, %109 : vector<8x512xf32>
    %111 = math.exp %110 : vector<8x512xf32>
    %112 = vector.extract_strided_slice %111 {offsets = [0, 0], sizes = [4, 512], strides = [1, 1]} : vector<8x512xf32> to vector<4x512xf32>
    %cst_61 = arith.constant dense<0.000000e+00> : vector<512xf32>
    %113 = vector.multi_reduction <add>, %112, %cst_61 [0] : vector<4x512xf32> to vector<512xf32>
    %114 = vector.shape_cast %113 : vector<512xf32> to vector<1x512xf32>
    %115 = tpu.reciprocal %114 {approx = true} : vector<1x512xf32> -> vector<1x512xf32>
    %116 = arith.mulf %114, %115 : vector<1x512xf32>
    %cst_62 = arith.constant 2.000000e+00 : f32
    %117 = vector.broadcast %cst_62 : f32 to vector<1x512xf32>
    %118 = arith.subf %117, %116 : vector<1x512xf32>
    %119 = arith.mulf %115, %118 : vector<1x512xf32>
    %120 = vector.broadcast %119 : vector<1x512xf32> to vector<8x512xf32>
    %121 = arith.mulf %111, %120 : vector<8x512xf32>
    %c0_63 = arith.constant 0 : index
    %c0_64 = arith.constant 0 : index
    %122 = vector.load %arg10[%c0_63, %c0_64] : memref<8x512xf32, #tpu.memory_space<vmem>>, vector<8x512xf32>
    tpu.vector_store %arg10[%c0_63, %c0_64], %121 {strides = array<i32>} : memref<8x512xf32, #tpu.memory_space<vmem>>, vector<8x512xf32>,
    return
  }
  func.func @transform_0(%arg0: i32) -> (i32, i32) {
    %c0_i32 = arith.constant 0 : i32
    %c0_i32_0 = arith.constant 0 : i32
    return %c0_i32, %arg0 : i32, i32
  }
  func.func @transform_1(%arg0: i32) -> (i32, i32) {
    %c0_i32 = arith.constant 0 : i32
    %c0_i32_0 = arith.constant 0 : i32
    return %c0_i32, %arg0 : i32, i32
  }
  func.func @transform_2(%arg0: i32) -> (i32, i32, i32) {
    %c0_i32 = arith.constant 0 : i32
    %c0_i32_0 = arith.constant 0 : i32
    %c0_i32_1 = arith.constant 0 : i32
    %c0_i32_2 = arith.constant 0 : i32
    return %c0_i32, %c0_i32_0, %c0_i32_1 : i32, i32, i32
  }
  func.func @transform_3(%arg0: i32) -> (i32, i32) {
    %c0_i32 = arith.constant 0 : i32
    %c0_i32_0 = arith.constant 0 : i32
    %c0_i32_1 = arith.constant 0 : i32
    return %c0_i32, %c0_i32_0 : i32, i32
  }
  func.func @transform_4(%arg0: i32) -> (i32, i32) {
    %c0_i32 = arith.constant 0 : i32
    %c0_i32_0 = arith.constant 0 : i32
    %c0_i32_1 = arith.constant 0 : i32
    return %c0_i32, %c0_i32_0 : i32, i32
  }
  func.func @transform_5(%arg0: i32) -> (i32, i32) {
    %c0_i32 = arith.constant 0 : i32
    %c0_i32_0 = arith.constant 0 : i32
    %c0_i32_1 = arith.constant 0 : i32
    return %c0_i32, %c0_i32_0 : i32, i32
  }
  func.func @transform_6(%arg0: i32) -> (i32, i32) {
    %c0_i32 = arith.constant 0 : i32
    %c0_i32_0 = arith.constant 0 : i32
    %c0_i32_1 = arith.constant 0 : i32
    return %c0_i32, %c0_i32_0 : i32, i32
  }
  func.func @transform_7(%arg0: i32) -> (i32, i32) {
    %c0_i32 = arith.constant 0 : i32
    %c0_i32_0 = arith.constant 0 : i32
    %c0_i32_1 = arith.constant 0 : i32
    return %c0_i32, %c0_i32_0 : i32, i32
  }
  func.func @transform_8(%arg0: i32) -> (i32, i32) {
    %c0_i32 = arith.constant 0 : i32
    %c0_i32_0 = arith.constant 0 : i32
    %c0_i32_1 = arith.constant 0 : i32
    return %c0_i32, %c0_i32_0 : i32, i32
  }
  func.func @transform_9(%arg0: i32) -> (i32, i32) {
    %c0_i32 = arith.constant 0 : i32
    %c0_i32_0 = arith.constant 0 : i32
    return %c0_i32, %arg0 : i32, i32
  }
}

</mosaic_0001>

<bundles_post_ra>
// kernel: tpu_custom_call.1
= control target key start
LH: loop header
LB: loop body
LE: loop exit
PB: predicated region body
PF: predicated region fallthrough
CT: control target
= control target key end

     0   :  { %14 = vsyncpa [#allocation3], 0  ;;  %s2398_s0 = inlined_call_operand.hbm [shape: f32[8,512], index: 0, kind: input, shape index: {}]   ;;  %s2399_s1 = inlined_call_operand.hbm [shape: f32[8,512], index: 1, kind: input, shape index: {}]   ;;  %s2400_s2 = inlined_call_operand.hbm [shape: f32[9,8,512], index: 2, kind: input, shape index: {}]   ;;  %s2401_s3 = inlined_call_operand.vmem [shape: f32[8,144], index: 3, kind: input, shape index: {}]   ;;  %s2402_s4 = inlined_call_operand.vmem [shape: f32[8,1], index: 4, kind: input, shape index: {}]   ;;  %s2403_s5 = inlined_call_operand.vmem [shape: f32[8,72], index: 5, kind: input, shape index: {}]   ;;  %s2404_s6 = inlined_call_operand.vmem [shape: f32[8,1], index: 6, kind: input, shape index: {}]   ;;  %s2405_s7 = inlined_call_operand.vmem [shape: f32[8,72], index: 7, kind: input, shape index: {}]   ;;  %s2406_s8 = inlined_call_operand.vmem [shape: f32[8,1], index: 8, kind: input, shape index: {}]   ;;  %s2407_s9 = inlined_call_operand.hbm [shape: f32[8,512], index: 9, kind: output, shape index: {}]  }
   0x1   :  { %15 = vsyncpa [#allocation6], 0 }
   0x2   :  { %16 = vsyncpa [#allocation4], 0  ;;  %s1492_s30 = smov [#allocation5]   ;;  %s1493_s11 = smov [#allocation2]  }
   0x3   :  { %s33_s10 = sshll.u32 %s1492_s30, 4  ;;  %s23_s12 = sshll.u32 %s1493_s11, 4  ;;  %s34_s10 = int_to_ptr.vmem [resolvable:$true] %s33_s10  ;;  %s24_s12 = int_to_ptr.vmem [resolvable:$true] %s23_s12 }
   0x4   :  { %s1398_s15 = scalar_lea.hbm %s2399_s1, 512 }
   0x5   :  { %p1399_p0 = scmp.ne.s32.totalorder %s2399_s1, %s1398_s15  ;;  %p1402_p1 = scmp.lt.u32.totalorder %s1398_s15, %s2399_s1 }
   0x7   :  { %p1404_p2 = pnand %p1402_p1, %p1399_p0 }
   0x9   :  { %1407 = shalt.err (!%p1404_p2)
}
   0xa   :  { %s1408_s20 = scalar_lea.vmem %s34_s10, 512  ;;  %p1413_p4 = scmp.lt.s32.totalorder %s34_s10, %s34_s10 }
   0xb   :  { %p1409_p3 = scmp.ne.s32.totalorder %s34_s10, %s1408_s20  ;;  %p1414_p5 = scmp.lt.s32.totalorder %s1408_s20, %s1408_s20 }
   0xd   :  { %p1415_p6 = por %p1414_p5, %p1413_p4 }
   0xf   :  { %p1416_p7 = pnand %p1415_p6, %p1409_p3 }
  0x11   :  { %1419 = shalt.err (!%p1416_p7)
}
  0x12   :  { %36 = dma.hbm_to_vmem [thread:$0]  %s2399_s1, 512, %s34_s10, [#allocation6]  }
  0x13   :  { %s1420_s25 = scalar_lea.hbm %s2398_s0, 512 }
  0x14   :  { %p1421_p8 = scmp.ne.s32.totalorder %s2398_s0, %s1420_s25  ;;  %p1424_p9 = scmp.lt.u32.totalorder %s1420_s25, %s2398_s0 }
  0x16   :  { %p1426_p10 = pnand %p1424_p9, %p1421_p8 }
  0x18   :  { %1429 = shalt.err (!%p1426_p10)
}
  0x19   :  { %s1430_s30 = scalar_lea.vmem %s24_s12, 512  ;;  %p1435_p12 = scmp.lt.s32.totalorder %s24_s12, %s24_s12 }
  0x1a   :  { %p1431_p11 = scmp.ne.s32.totalorder %s24_s12, %s1430_s30  ;;  %p1436_p13 = scmp.lt.s32.totalorder %s1430_s30, %s1430_s30 }
  0x1c   :  { %p1437_p0 = por %p1436_p13, %p1435_p12 }
  0x1e   :  { %p1438_p1 = pnand %p1437_p0, %p1431_p11 }
  0x20   :  { %1441 = shalt.err (!%p1438_p1)
}
  0x21   :  { %26 = dma.hbm_to_vmem [thread:$0]  %s2398_s0, 512, %s24_s12, [#allocation3]  }
  0x22   :  { %s1494_s11 = smov [#allocation7]   ;;  %s1442_s16 = scalar_lea.hbm %s2400_s2, 4608 }
  0x23   :  { %s42_s13 = sshll.u32 %s1494_s11, 4  ;;  %p1443_p2 = scmp.ne.s32.totalorder %s2400_s2, %s1442_s16  ;;  %s43_s13 = int_to_ptr.vmem [resolvable:$true] %s42_s13 }
  0x24   :  { %p1446_p3 = scmp.lt.u32.totalorder %s1442_s16, %s2400_s2 }
  0x26   :  { %p1448_p4 = pnand %p1446_p3, %p1443_p2 }
  0x28   :  { %1451 = shalt.err (!%p1448_p4)
}
  0x29   :  { %s1452_s21 = scalar_lea.vmem %s43_s13, 4608  ;;  %p1457_p6 = scmp.lt.s32.totalorder %s43_s13, %s43_s13 }
  0x2a   :  { %p1453_p5 = scmp.ne.s32.totalorder %s43_s13, %s1452_s21  ;;  %p1458_p7 = scmp.lt.s32.totalorder %s1452_s21, %s1452_s21 }
  0x2c   :  { %p1459_p8 = por %p1458_p7, %p1457_p6 }
  0x2e   :  { %p1460_p9 = pnand %p1459_p8, %p1453_p5 }
  0x30   :  { %1463 = shalt.err (!%p1460_p9)
}
  0x31   :  { %s1495_s0 = smov 512   ;;  %s1496_s12 = smov 32  }
  0x32   :  { %48 = dma.hbm_to_vmem [thread:$0]  %s2400_s2, 4608, %s43_s13, [#allocation6], %s1495_s0, %s1495_s0, %s1496_s12  }
  0x33   :  { %1486 = dma.done.wait [#allocation3], 512  }
  0x34   :  { %1487 = vsyncadd [#allocation3], 4294966784 }
  0x35   :  { %1488 = dma.done.wait [#allocation6], 5120  }
  0x36   :  { %1489 = vsyncadd [#allocation6], 4294962176  ;;  %v1594_v0 = vld [vmem:[#allocation2 + $0x10] sm:$0xff]  ;;  %v1596_v1 = vld [vmem:[#allocation2] sm:$0xff]  ;;  %s1497_s24 = smov 17   ;;  %s1498_s2 = smov 16   ;;  %v125_v8 = vlaneseq }
  0x37   :  { %121 = vrot.lane.b32.xlu1 %v1594_v0, %s1497_s24  ;;  %117 = vrot.lane.b32.xlu0 %v1596_v1, %s1497_s24  ;;  %v1602_v2 = vld [vmem:[#allocation2 + $0x18] sm:$0xff]  ;;  %v1604_v3 = vld [vmem:[#allocation2 + $0x8] sm:$0xff]  ;;  %v1612_v5 = vld [vmem:[#allocation5] sm:$0xff]  ;;  %s1499_s25 = smov 15   ;;  %s1500_s26 = smov 1   ;;  %vm391_vm0 = vcmask 130048  }
  0x38   :  { %v1610_v4 = vld [vmem:[#allocation5 + $0x8] sm:$0xff]  ;;  %v1618_v6 = vld [vmem:[#allocation5 + $0x18] sm:$0xff]  ;;  %v1620_v7 = vld [vmem:[#allocation5 + $0x10] sm:$0xff]  ;;  %s1501_s27 = smov 127   ;;  %s1502_s28 = smov 113   ;;  %v1726_v11 = vand.u32 127, %v125_v8 }
  0x39   :  { %s1503_s29 = smov 112   ;;  %s1504_s30 = smov 111   ;;  %v384_v12 = vld [vmem:[%s2401_s3 + $0x8] sm:$0xff]  ;;  %v1505_v17 = vmov 0   ;;  %v1748_v22 = vld [vmem:[#allocation7] sm:$0xff]  ;;  %v1750_v23 = vld [vmem:[#allocation7 + $0x18] sm:$0xff] }
  0x3a   :  { %vm127_vm1 = vcmp.lt.s32.totalorder %v1726_v11, 17  ;;  %1215 = vmatprep.mubr.msk.f32.mxu0 %vm391_vm0, %v384_v12  ;;  %1216 = vmatprep.mubr.msk.f32.mxu1 %vm391_vm0, %v384_v12  ;;  %v1740_v15 = vld [vmem:[#allocation7 + $0x8] sm:$0xff]  ;;  %v1762_v28 = vld [vmem:[#allocation7 + $0x10] sm:$0xff]  ;;  %v385_v29 = vld [vmem:[%s2402_s4] sm:$0xff]  ;;  %vm160_vm2 = vcmp.lt.s32.totalorder %v1726_v11, 16  ;;  %vm193_vm3 = vcmp.lt.s32.totalorder %v1726_v11, 15 }
  0x3b   :  { %123 = vrot.lane.b32.xlu1 %v1602_v2, %s1497_s24  ;;  %119 = vrot.lane.b32.xlu0 %v1604_v3, %s1497_s24  ;;  %v1780_v49 = vld [vmem:[#allocation7 + $0x28] sm:$0xff]  ;;  %v1784_v53 = vld [vmem:[#allocation7 + $0x20] sm:$0xff]  ;;  %v1791_v57 = vld [vmem:[#allocation7 + $0x30] sm:$0xff]  ;;  %vm226_vm4 = vcmp.lt.s32.totalorder %v1726_v11, 1  ;;  %vm259_vm5 = vcmp.lt.s32.totalorder %v1726_v11, 127  ;;  %vm292_vm6 = vcmp.lt.s32.totalorder %v1726_v11, 113 }
  0x3c   :  { %1373 = vset.pattern.permute.xlu0 %v1505_v17  ;;  %1374 = vset.pattern.permute.xlu1 %v1505_v17  ;;  %v1796_v60 = vld [vmem:[#allocation7 + $0x38] sm:$0xff]  ;;  %vm325_vm7 = vcmp.lt.s32.totalorder %v1726_v11, 112  ;;  %vm358_vm8 = vcmp.lt.s32.totalorder %v1726_v11, 111  ;;  %vm676_vm9 = vcmask 588800   ;;  %vm1106_vm10 = vcmask 1043456  }
  0x3f   :  { %138 = vrot.lane.b32.xlu1 %v1610_v4, %s1497_s24  ;;  %136 = vrot.lane.b32.xlu0 %v1612_v5, %s1497_s24 }
  0x43   :  { %142 = vrot.lane.b32.xlu1 %v1618_v6, %s1497_s24  ;;  %140 = vrot.lane.b32.xlu0 %v1620_v7, %s1497_s24 }
  0x47   :  { %154 = vrot.lane.b32.xlu1 %v1604_v3, %s1498_s2  ;;  %152 = vrot.lane.b32.xlu0 %v1596_v1, %s1498_s2 }
  0x4b   :  { %158 = vrot.lane.b32.xlu1 %v1602_v2, %s1498_s2  ;;  %156 = vrot.lane.b32.xlu0 %v1594_v0, %s1498_s2 }
  0x4f   :  { %171 = vrot.lane.b32.xlu1 %v1610_v4, %s1498_s2  ;;  %169 = vrot.lane.b32.xlu0 %v1612_v5, %s1498_s2 }
  0x53   :  { %175 = vrot.lane.b32.xlu1 %v1618_v6, %s1498_s2  ;;  %173 = vrot.lane.b32.xlu0 %v1620_v7, %s1498_s2 }
  0x57   :  { %187 = vrot.lane.b32.xlu1 %v1604_v3, %s1499_s25  ;;  %185 = vrot.lane.b32.xlu0 %v1596_v1, %s1499_s25 }
  0x5b   :  { %191 = vrot.lane.b32.xlu1 %v1602_v2, %s1499_s25  ;;  %189 = vrot.lane.b32.xlu0 %v1594_v0, %s1499_s25 }
  0x5f   :  { %204 = vrot.lane.b32.xlu1 %v1610_v4, %s1499_s25  ;;  %202 = vrot.lane.b32.xlu0 %v1612_v5, %s1499_s25 }
  0x63   :  { %208 = vrot.lane.b32.xlu1 %v1618_v6, %s1499_s25  ;;  %206 = vrot.lane.b32.xlu0 %v1620_v7, %s1499_s25 }
  0x67   :  { %220 = vrot.lane.b32.xlu1 %v1604_v3, %s1500_s26  ;;  %218 = vrot.lane.b32.xlu0 %v1596_v1, %s1500_s26 }
  0x6b   :  { %224 = vrot.lane.b32.xlu1 %v1602_v2, %s1500_s26  ;;  %222 = vrot.lane.b32.xlu0 %v1594_v0, %s1500_s26 }
  0x6f   :  { %237 = vrot.lane.b32.xlu1 %v1610_v4, %s1500_s26  ;;  %235 = vrot.lane.b32.xlu0 %v1612_v5, %s1500_s26 }
  0x73   :  { %241 = vrot.lane.b32.xlu1 %v1618_v6, %s1500_s26  ;;  %239 = vrot.lane.b32.xlu0 %v1620_v7, %s1500_s26 }
  0x77   :  { %253 = vrot.lane.b32.xlu1 %v1604_v3, %s1501_s27  ;;  %251 = vrot.lane.b32.xlu0 %v1596_v1, %s1501_s27 }
  0x7b   :  { %257 = vrot.lane.b32.xlu1 %v1602_v2, %s1501_s27  ;;  %255 = vrot.lane.b32.xlu0 %v1594_v0, %s1501_s27 }
  0x7f   :  { %270 = vrot.lane.b32.xlu1 %v1610_v4, %s1501_s27  ;;  %268 = vrot.lane.b32.xlu0 %v1612_v5, %s1501_s27 }
  0x83   :  { %274 = vrot.lane.b32.xlu1 %v1618_v6, %s1501_s27  ;;  %272 = vrot.lane.b32.xlu0 %v1620_v7, %s1501_s27 }
  0x87   :  { %286 = vrot.lane.b32.xlu1 %v1604_v3, %s1502_s28  ;;  %284 = vrot.lane.b32.xlu0 %v1596_v1, %s1502_s28 }
  0x8b   :  { %290 = vrot.lane.b32.xlu1 %v1602_v2, %s1502_s28  ;;  %288 = vrot.lane.b32.xlu0 %v1594_v0, %s1502_s28 }
  0x8f   :  { %303 = vrot.lane.b32.xlu1 %v1610_v4, %s1502_s28  ;;  %301 = vrot.lane.b32.xlu0 %v1612_v5, %s1502_s28 }
  0x93   :  { %307 = vrot.lane.b32.xlu1 %v1618_v6, %s1502_s28  ;;  %305 = vrot.lane.b32.xlu0 %v1620_v7, %s1502_s28 }
  0x97   :  { %319 = vrot.lane.b32.xlu1 %v1604_v3, %s1503_s29  ;;  %317 = vrot.lane.b32.xlu0 %v1596_v1, %s1503_s29 }
  0x9b   :  { %323 = vrot.lane.b32.xlu1 %v1602_v2, %s1503_s29  ;;  %321 = vrot.lane.b32.xlu0 %v1594_v0, %s1503_s29 }
  0x9f   :  { %336 = vrot.lane.b32.xlu1 %v1610_v4, %s1503_s29  ;;  %334 = vrot.lane.b32.xlu0 %v1612_v5, %s1503_s29 }
  0xa3   :  { %340 = vrot.lane.b32.xlu1 %v1618_v6, %s1503_s29  ;;  %338 = vrot.lane.b32.xlu0 %v1620_v7, %s1503_s29 }
  0xa7   :  { %352 = vrot.lane.b32.xlu1 %v1604_v3, %s1504_s30  ;;  %350 = vrot.lane.b32.xlu0 %v1596_v1, %s1504_s30 }
  0xa9   :  { %v122_v9 = vpop.permute.xlu1 %121  ;;  %v118_v10 = vpop.permute.xlu0 %117 }
  0xab   :  { %356 = vrot.lane.b32.xlu1 %v1602_v2, %s1504_s30  ;;  %354 = vrot.lane.b32.xlu0 %v1594_v0, %s1504_s30 }
  0xad   :  { %v124_v13 = vpop.permute.xlu1 %123  ;;  %v120_v14 = vpop.permute.xlu0 %119 }
  0xae   :  { %v130_v16 = vsel %vm127_vm1, %v118_v10, %v120_v14  ;;  %v131_v20 = vsel %vm127_vm1, %v124_v13, %v118_v10  ;;  %v128_v24 = vsel %vm127_vm1, %v122_v9, %v124_v13  ;;  %v129_v25 = vsel %vm127_vm1, %v120_v14, %v122_v9 }
  0xaf   :  { %369 = vrot.lane.b32.xlu1 %v1610_v4, %s1504_s30  ;;  %367 = vrot.lane.b32.xlu0 %v1612_v5, %s1504_s30  ;;  %v133_v26 = vmul.f32 %v130_v16, %v1740_v15  ;;  %v132_v33 = vmul.f32 %v131_v20, %v1748_v22  ;;  %v135_v34 = vmul.f32 %v128_v24, %v1750_v23 }
  0xb0   :  { %v134_v38 = vmul.f32 %v129_v25, %v1762_v28 }
  0xb1   :  { %v139_v18 = vpop.permute.xlu1 %138  ;;  %v137_v19 = vpop.permute.xlu0 %136 }
  0xb2   :  { %v146_v21 = vsel %vm127_vm1, %v137_v19, %v139_v18 }
  0xb3   :  { %373 = vrot.lane.b32.xlu1 %v1618_v6, %s1504_s30  ;;  %371 = vrot.lane.b32.xlu0 %v1620_v7, %s1504_s30  ;;  %v149_v27 = vmul.f32 %v146_v21, %v1740_v15 }
  0xb5   :  { %v143_v30 = vpop.permute.xlu1 %142  ;;  %v141_v31 = vpop.permute.xlu0 %140  ;;  %v1221_v32 = vpack.c.bf16 %v149_v27, %v133_v26 }
  0xb6   :  { %v147_v35 = vsel %vm127_vm1, %v143_v30, %v137_v19  ;;  %v145_v36 = vsel %vm127_vm1, %v139_v18, %v141_v31  ;;  %v144_v37 = vsel %vm127_vm1, %v141_v31, %v143_v30  ;;  %v1813_v30 = vld [vmem:[#allocation7 + $0x48] sm:$0xff] }
  0xb7   :  { %1222 = vmatprep.subr.bf16.mxu0 %v1221_v32  ;;  %v148_v39 = vmul.f32 %v147_v35, %v1748_v22  ;;  %v151_v40 = vmul.f32 %v144_v37, %v1750_v23  ;;  %v150_v41 = vmul.f32 %v145_v36, %v1762_v28  ;;  %388 = vperm.xlu0 %1373, %v385_v29  }
  0xb9   :  { %v155_v42 = vpop.permute.xlu1 %154  ;;  %v153_v43 = vpop.permute.xlu0 %152  ;;  %v1223_v44 = vpack.c.bf16 %v148_v39, %v132_v33  ;;  %v1257_v45 = vpack.c.bf16 %v151_v40, %v135_v34  ;;  %v1259_v46 = vpack.c.bf16 %v150_v41, %v134_v38  ;;  %v1817_v34 = vld [vmem:[#allocation7 + $0x40] sm:$0xff]  ;;  %v1824_v38 = vld [vmem:[#allocation7 + $0x50] sm:$0xff]  ;;  %v1829_v41 = vld [vmem:[#allocation7 + $0x58] sm:$0xff] }
  0xba   :  { %v163_v50 = vsel %vm160_vm2, %v153_v43, %v155_v42 }
  0xbb   :  { %1224 = vmatpush1.bf16.msra.mxu0 %v1223_v44  ;;  %1258 = vmatprep.subr.bf16.mxu1 %v1257_v45  ;;  %v166_v56 = vmul.f32 %v163_v50, %v1780_v49 }
  0xbc   :  { %1260 = vmatpush1.bf16.msra.mxu1 %v1259_v46 }
  0xbd   :  { %v159_v47 = vpop.permute.xlu1 %158  ;;  %v157_v48 = vpop.permute.xlu0 %156 }
  0xbe   :  { %v164_v54 = vsel %vm160_vm2, %v159_v47, %v153_v43  ;;  %v162_v58 = vsel %vm160_vm2, %v155_v42, %v157_v48  ;;  %v161_v61 = vsel %vm160_vm2, %v157_v48, %v159_v47 }
  0xbf   :  { %v165_v62 = vmul.f32 %v164_v54, %v1784_v53  ;;  %v167_v10 = vmul.f32 %v162_v58, %v1791_v57  ;;  %v168_v16 = vmul.f32 %v161_v61, %v1796_v60 }
  0xc1   :  { %v172_v51 = vpop.permute.xlu1 %171  ;;  %v170_v52 = vpop.permute.xlu0 %169 }
  0xc2   :  { %v179_v55 = vsel %vm160_vm2, %v170_v52, %v172_v51 }
  0xc3   :  { %v182_v59 = vmul.f32 %v179_v55, %v1780_v49 }
  0xc5   :  { %v176_v63 = vpop.permute.xlu1 %175  ;;  %v174_v8 = vpop.permute.xlu0 %173  ;;  %v1225_v9 = vpack.c.bf16 %v182_v59, %v166_v56 }
  0xc6   :  { %v180_v12 = vsel %vm160_vm2, %v176_v63, %v170_v52  ;;  %v177_v13 = vsel %vm160_vm2, %v174_v8, %v176_v63  ;;  %v178_v14 = vsel %vm160_vm2, %v172_v51, %v174_v8 }
  0xc7   :  { %v181_v17 = vmul.f32 %v180_v12, %v1784_v53  ;;  %v183_v18 = vmul.f32 %v178_v14, %v1791_v57  ;;  %v184_v19 = vmul.f32 %v177_v13, %v1796_v60  ;;  %1226 = vmatprep.subr.bf16.mxu0 %v1225_v9 }
  0xc9   :  { %v188_v20 = vpop.permute.xlu1 %187  ;;  %v186_v21 = vpop.permute.xlu0 %185  ;;  %v1227_v24 = vpack.c.bf16 %v181_v17, %v165_v62  ;;  %v1261_v25 = vpack.c.bf16 %v184_v19, %v168_v16  ;;  %v1263_v26 = vpack.c.bf16 %v183_v18, %v167_v10  ;;  %v1846_v10 = vld [vmem:[#allocation7 + $0x68] sm:$0xff]  ;;  %v1850_v16 = vld [vmem:[#allocation7 + $0x60] sm:$0xff] }
  0xca   :  { %v196_v31 = vsel %vm193_vm3, %v186_v21, %v188_v20 }
  0xcb   :  { %1228 = vmatpush1.bf16.msra.mxu0 %v1227_v24  ;;  %1262 = vmatprep.subr.bf16.mxu1 %v1261_v25  ;;  %v199_v37 = vmul.f32 %v196_v31, %v1813_v30  ;;  %v1862_v25 = vld [vmem:[#allocation7 + $0x78] sm:$0xff] }
  0xcc   :  { %1264 = vmatpush1.bf16.msra.mxu1 %v1263_v26 }
  0xcd   :  { %v192_v27 = vpop.permute.xlu1 %191  ;;  %v190_v29 = vpop.permute.xlu0 %189 }
  0xce   :  { %v197_v35 = vsel %vm193_vm3, %v192_v27, %v186_v21  ;;  %v195_v39 = vsel %vm193_vm3, %v188_v20, %v190_v29  ;;  %v194_v42 = vsel %vm193_vm3, %v190_v29, %v192_v27  ;;  %v1857_v20 = vld [vmem:[#allocation7 + $0x70] sm:$0xff] }
  0xcf   :  { %v198_v43 = vmul.f32 %v197_v35, %v1817_v34  ;;  %v200_v47 = vmul.f32 %v195_v39, %v1824_v38  ;;  %v201_v52 = vmul.f32 %v194_v42, %v1829_v41 }
  0xd1   :  { %v205_v32 = vpop.permute.xlu1 %204  ;;  %v203_v33 = vpop.permute.xlu0 %202 }
  0xd2   :  { %v212_v36 = vsel %vm193_vm3, %v203_v33, %v205_v32 }
  0xd3   :  { %v215_v40 = vmul.f32 %v212_v36, %v1813_v30 }
  0xd5   :  { %v209_v44 = vpop.permute.xlu1 %208  ;;  %v207_v45 = vpop.permute.xlu0 %206  ;;  %v1229_v46 = vpack.c.bf16 %v215_v40, %v199_v37 }
  0xd6   :  { %v213_v48 = vsel %vm193_vm3, %v209_v44, %v203_v33  ;;  %v210_v50 = vsel %vm193_vm3, %v207_v45, %v209_v44  ;;  %v211_v51 = vsel %vm193_vm3, %v205_v32, %v207_v45  ;;  %v1237_v44 = vpack.c.bf16 %v1610_v4, %v1604_v3 }
  0xd7   :  { %v214_v54 = vmul.f32 %v213_v48, %v1817_v34  ;;  %v216_v55 = vmul.f32 %v211_v51, %v1824_v38  ;;  %v217_v56 = vmul.f32 %v210_v50, %v1829_v41  ;;  %1230 = vmatprep.subr.bf16.mxu0 %v1229_v46  ;;  %v1273_v51 = vpack.c.bf16 %v1618_v6, %v1602_v2  ;;  %v1887_v2 = vld [vmem:[#allocation7 + $0xb8] sm:$0xff] }
  0xd9   :  { %v221_v58 = vpop.permute.xlu1 %220  ;;  %v219_v59 = vpop.permute.xlu0 %218  ;;  %v1231_v61 = vpack.c.bf16 %v214_v54, %v198_v43  ;;  %v1265_v62 = vpack.c.bf16 %v217_v56, %v201_v52  ;;  %v1267_v63 = vpack.c.bf16 %v216_v55, %v200_v47  ;;  %v1239_v52 = vpack.c.bf16 %v1612_v5, %v1596_v1  ;;  %v1891_v1 = vld [vmem:[#allocation7 + $0xa8] sm:$0xff] }
  0xda   :  { %v229_v12 = vsel %vm226_vm4, %v219_v59, %v221_v58  ;;  %v1275_v54 = vpack.c.bf16 %v1620_v7, %v1594_v0  ;;  %v1897_v7 = vld [vmem:[#allocation7 + $0xb0] sm:$0xff] }
  0xdb   :  { %1232 = vmatpush1.bf16.msra.mxu0 %v1231_v61  ;;  %1266 = vmatprep.subr.bf16.mxu1 %v1265_v62  ;;  %v232_v19 = vmul.f32 %v229_v12, %v1846_v10 }
  0xdc   :  { %1268 = vmatpush1.bf16.msra.mxu1 %v1267_v63 }
  0xdd   :  { %v225_v8 = vpop.permute.xlu1 %224  ;;  %v223_v9 = vpop.permute.xlu0 %222 }
  0xde   :  { %v230_v17 = vsel %vm226_vm4, %v225_v8, %v219_v59  ;;  %v228_v21 = vsel %vm226_vm4, %v221_v58, %v223_v9  ;;  %v227_v26 = vsel %vm226_vm4, %v223_v9, %v225_v8  ;;  %v1901_v59 = vld [vmem:[#allocation7 + $0xa0] sm:$0xff] }
  0xdf   :  { %v231_v27 = vmul.f32 %v230_v17, %v1850_v16  ;;  %v233_v33 = vmul.f32 %v228_v21, %v1857_v20  ;;  %v234_v39 = vmul.f32 %v227_v26, %v1862_v25 }
  0xe1   :  { %v238_v13 = vpop.permute.xlu1 %237  ;;  %v236_v14 = vpop.permute.xlu0 %235 }
  0xe2   :  { %v245_v18 = vsel %vm226_vm4, %v236_v14, %v238_v13 }
  0xe3   :  { %v248_v24 = vmul.f32 %v245_v18, %v1846_v10 }
  0xe5   :  { %v242_v29 = vpop.permute.xlu1 %241  ;;  %v240_v31 = vpop.permute.xlu0 %239  ;;  %v1233_v32 = vpack.c.bf16 %v248_v24, %v232_v19 }
  0xe6   :  { %v246_v35 = vsel %vm226_vm4, %v242_v29, %v236_v14  ;;  %v243_v36 = vsel %vm226_vm4, %v240_v31, %v242_v29  ;;  %v244_v37 = vsel %vm226_vm4, %v238_v13, %v240_v31 }
  0xe7   :  { %v247_v40 = vmul.f32 %v246_v35, %v1850_v16  ;;  %v249_v42 = vmul.f32 %v244_v37, %v1857_v20  ;;  %v250_v43 = vmul.f32 %v243_v36, %v1862_v25  ;;  %1234 = vmatprep.subr.bf16.mxu0 %v1233_v32 }
  0xe9   :  { %v254_v45 = vpop.permute.xlu1 %253  ;;  %v252_v46 = vpop.permute.xlu0 %251  ;;  %v1235_v47 = vpack.c.bf16 %v247_v40, %v231_v27  ;;  %v1269_v48 = vpack.c.bf16 %v250_v43, %v234_v39  ;;  %v1271_v50 = vpack.c.bf16 %v249_v42, %v233_v33  ;;  %v1920_v42 = vld [vmem:[#allocation7 + $0xd8] sm:$0xff] }
  0xea   :  { %v262_v61 = vsel %vm259_vm5, %v252_v46, %v254_v45 }
  0xeb   :  { %1236 = vmatpush1.bf16.msra.mxu0 %v1235_v47  ;;  %1270 = vmatprep.subr.bf16.mxu1 %v1269_v48  ;;  %v264_v26 = vmul.f32 %v262_v61, %v1901_v59  ;;  %v1930_v47 = vld [vmem:[#allocation7 + $0xd0] sm:$0xff] }
  0xec   :  { %1272 = vmatpush1.bf16.msra.mxu1 %v1271_v50  ;;  %1238 = vmatprep.subr.bf16.mxu0 %v1237_v44  ;;  %v1924_v44 = vld [vmem:[#allocation7 + $0xc8] sm:$0xff]  ;;  %v1934_v50 = vld [vmem:[#allocation7 + $0xc0] sm:$0xff] }
  0xed   :  { %v258_v55 = vpop.permute.xlu1 %257  ;;  %v256_v3 = vpop.permute.xlu0 %255  ;;  %1274 = vmatprep.subr.bf16.mxu1 %v1273_v51 }
  0xee   :  { %v263_v6 = vsel %vm259_vm5, %v258_v55, %v252_v46  ;;  %v261_v5 = vsel %vm259_vm5, %v254_v45, %v256_v3  ;;  %v260_v58 = vsel %vm259_vm5, %v256_v3, %v258_v55 }
  0xef   :  { %1240 = vmatpush1.bf16.msra.mxu0 %v1239_v52  ;;  %v267_v62 = vmul.f32 %v263_v6, %v1887_v2  ;;  %v265_v63 = vmul.f32 %v261_v5, %v1891_v1  ;;  %v266_v18 = vmul.f32 %v260_v58, %v1897_v7 }
  0xf0   :  { %1276 = vmatpush1.bf16.msra.mxu1 %v1275_v54 }
  0xf1   :  { %v271_v4 = vpop.permute.xlu1 %270  ;;  %v269_v56 = vpop.permute.xlu0 %268 }
  0xf2   :  { %v278_v0 = vsel %vm259_vm5, %v269_v56, %v271_v4 }
  0xf3   :  { %v280_v12 = vmul.f32 %v278_v0, %v1901_v59 }
  0xf5   :  { %v275_v8 = vpop.permute.xlu1 %274  ;;  %v273_v9 = vpop.permute.xlu0 %272  ;;  %v1243_v35 = vpack.c.bf16 %v280_v12, %v264_v26  ;;  %v1953_v26 = vld [vmem:[#allocation7 + $0xf8] sm:$0xff] }
  0xf6   :  { %v279_v13 = vsel %vm259_vm5, %v275_v8, %v269_v56  ;;  %v276_v14 = vsel %vm259_vm5, %v273_v9, %v275_v8  ;;  %v277_v17 = vsel %vm259_vm5, %v271_v4, %v273_v9 }
  0xf7   :  { %v283_v19 = vmul.f32 %v279_v13, %v1887_v2  ;;  %v281_v21 = vmul.f32 %v277_v17, %v1891_v1  ;;  %v282_v24 = vmul.f32 %v276_v14, %v1897_v7 }
  0xf9   :  { %v287_v27 = vpop.permute.xlu1 %286  ;;  %v285_v29 = vpop.permute.xlu0 %284  ;;  %v1241_v31 = vpack.c.bf16 %v281_v21, %v265_v63  ;;  %v1277_v32 = vpack.c.bf16 %v283_v19, %v267_v62  ;;  %v1279_v33 = vpack.c.bf16 %v282_v24, %v266_v18 }
  0xfa   :  { %v295_v51 = vsel %vm292_vm6, %v285_v29, %v287_v27 }
  0xfb   :  { %1242 = vmatprep.subr.bf16.mxu0 %v1241_v31  ;;  %1278 = vmatprep.subr.bf16.mxu1 %v1277_v32  ;;  %v297_v63 = vmul.f32 %v295_v51, %v1934_v50 }
  0xfc   :  { %1244 = vmatpush1.bf16.msra.mxu0 %v1243_v35  ;;  %1280 = vmatpush1.bf16.msra.mxu1 %v1279_v33  ;;  %v1963_v33 = vld [vmem:[#allocation7 + $0xf0] sm:$0xff] }
  0xfd   :  { %v291_v36 = vpop.permute.xlu1 %290  ;;  %v289_v37 = vpop.permute.xlu0 %288 }
  0xfe   :  { %v296_v43 = vsel %vm292_vm6, %v291_v36, %v285_v29  ;;  %v294_v45 = vsel %vm292_vm6, %v287_v27, %v289_v37  ;;  %v293_v48 = vsel %vm292_vm6, %v289_v37, %v291_v36  ;;  %v1957_v29 = vld [vmem:[#allocation7 + $0xe8] sm:$0xff]  ;;  %v1967_v36 = vld [vmem:[#allocation7 + $0xe0] sm:$0xff] }
  0xff   :  { %v300_v52 = vmul.f32 %v296_v43, %v1920_v42  ;;  %v298_v54 = vmul.f32 %v294_v45, %v1924_v44  ;;  %v299_v0 = vmul.f32 %v293_v48, %v1930_v47 }
 0x101   :  { %v304_v39 = vpop.permute.xlu1 %303  ;;  %v302_v40 = vpop.permute.xlu0 %301 }
 0x102   :  { %v311_v46 = vsel %vm292_vm6, %v302_v40, %v304_v39 }
 0x103   :  { %v313_v4 = vmul.f32 %v311_v46, %v1934_v50 }
 0x105   :  { %v308_v55 = vpop.permute.xlu1 %307  ;;  %v306_v3 = vpop.permute.xlu0 %305  ;;  %v1247_v17 = vpack.c.bf16 %v313_v4, %v297_v63 }
 0x106   :  { %v312_v56 = vsel %vm292_vm6, %v308_v55, %v302_v40  ;;  %v309_v6 = vsel %vm292_vm6, %v306_v3, %v308_v55  ;;  %v310_v5 = vsel %vm292_vm6, %v304_v39, %v306_v3 }
 0x107   :  { %v316_v58 = vmul.f32 %v312_v56, %v1920_v42  ;;  %v314_v61 = vmul.f32 %v310_v5, %v1924_v44  ;;  %v315_v62 = vmul.f32 %v309_v6, %v1930_v47 }
 0x109   :  { %v320_v8 = vpop.permute.xlu1 %319  ;;  %v318_v9 = vpop.permute.xlu0 %317  ;;  %v1245_v12 = vpack.c.bf16 %v314_v61, %v298_v54  ;;  %v1281_v13 = vpack.c.bf16 %v316_v58, %v300_v52  ;;  %v1283_v14 = vpack.c.bf16 %v315_v62, %v299_v0 }
 0x10a   :  { %v328_v37 = vsel %vm325_vm7, %v318_v9, %v320_v8 }
 0x10b   :  { %1246 = vmatprep.subr.bf16.mxu0 %v1245_v12  ;;  %1282 = vmatprep.subr.bf16.mxu1 %v1281_v13  ;;  %v330_v56 = vmul.f32 %v328_v37, %v1967_v36  ;;  %v1986_v13 = vld [vmem:[#allocation7 + $0x118] sm:$0xff] }
 0x10c   :  { %1248 = vmatpush1.bf16.msra.mxu0 %v1247_v17  ;;  %1284 = vmatpush1.bf16.msra.mxu1 %v1283_v14  ;;  %v1990_v17 = vld [vmem:[#allocation7 + $0x108] sm:$0xff] }
 0x10d   :  { %v324_v18 = vpop.permute.xlu1 %323  ;;  %v322_v19 = vpop.permute.xlu0 %321 }
 0x10e   :  { %v329_v27 = vsel %vm325_vm7, %v324_v18, %v318_v9  ;;  %v327_v31 = vsel %vm325_vm7, %v320_v8, %v322_v19  ;;  %v326_v35 = vsel %vm325_vm7, %v322_v19, %v324_v18 }
 0x10f   :  { %v333_v39 = vmul.f32 %v329_v27, %v1953_v26  ;;  %v331_v40 = vmul.f32 %v327_v31, %v1957_v29  ;;  %v332_v54 = vmul.f32 %v326_v35, %v1963_v33  ;;  %v2000_v27 = vld [vmem:[#allocation7 + $0x100] sm:$0xff] }
 0x111   :  { %v337_v21 = vpop.permute.xlu1 %336  ;;  %v335_v24 = vpop.permute.xlu0 %334 }
 0x112   :  { %v344_v32 = vsel %vm325_vm7, %v335_v24, %v337_v21 }
 0x113   :  { %v346_v46 = vmul.f32 %v344_v32, %v1967_v36 }
 0x115   :  { %v341_v43 = vpop.permute.xlu1 %340  ;;  %v339_v45 = vpop.permute.xlu0 %338  ;;  %v1251_v62 = vpack.c.bf16 %v346_v46, %v330_v56 }
 0x116   :  { %v345_v48 = vsel %vm325_vm7, %v341_v43, %v335_v24  ;;  %v342_v51 = vsel %vm325_vm7, %v339_v45, %v341_v43  ;;  %v343_v52 = vsel %vm325_vm7, %v337_v21, %v339_v45  ;;  %v1996_v21 = vld [vmem:[#allocation7 + $0x110] sm:$0xff] }
 0x117   :  { %v349_v55 = vmul.f32 %v345_v48, %v1953_v26  ;;  %v347_v3 = vmul.f32 %v343_v52, %v1957_v29  ;;  %v348_v4 = vmul.f32 %v342_v51, %v1963_v33 }
 0x119   :  { %v353_v6 = vpop.permute.xlu1 %352  ;;  %v351_v5 = vpop.permute.xlu0 %350  ;;  %v1249_v0 = vpack.c.bf16 %v347_v3, %v331_v40  ;;  %v1285_v58 = vpack.c.bf16 %v349_v55, %v333_v39  ;;  %v1287_v61 = vpack.c.bf16 %v348_v4, %v332_v54 }
 0x11a   :  { %v361_v31 = vsel %vm358_vm8, %v351_v5, %v353_v6 }
 0x11b   :  { %1250 = vmatprep.subr.bf16.mxu0 %v1249_v0  ;;  %1286 = vmatprep.subr.bf16.mxu1 %v1285_v58  ;;  %v363_v55 = vmul.f32 %v361_v31, %v2000_v27 }
 0x11c   :  { %1252 = vmatpush1.bf16.msra.mxu0 %v1251_v62  ;;  %1288 = vmatpush1.bf16.msra.mxu1 %v1287_v61 }
 0x11d   :  { %v357_v63 = vpop.permute.xlu1 %356  ;;  %v355_v8 = vpop.permute.xlu0 %354 }
 0x11e   :  { %v362_v14 = vsel %vm358_vm8, %v357_v63, %v351_v5  ;;  %v360_v18 = vsel %vm358_vm8, %v353_v6, %v355_v8  ;;  %v359_v24 = vsel %vm358_vm8, %v355_v8, %v357_v63  ;;  %v383_v5 = vld [vmem:[%s2401_s3] sm:$0xff] }
 0x11f   :  { %v366_v32 = vmul.f32 %v362_v14, %v1986_v13  ;;  %v364_v35 = vmul.f32 %v360_v18, %v1990_v17  ;;  %v365_v48 = vmul.f32 %v359_v24, %v1996_v21 }
 0x121   :  { %v370_v9 = vpop.permute.xlu1 %369  ;;  %v368_v12 = vpop.permute.xlu0 %367 }
 0x122   :  { %v377_v19 = vsel %vm358_vm8, %v368_v12, %v370_v9 }
 0x123   :  { %v379_v40 = vmul.f32 %v377_v19, %v2000_v27 }
 0x125   :  { %v374_v37 = vpop.permute.xlu1 %373  ;;  %v372_v39 = vpop.permute.xlu0 %371  ;;  %v1255_v6 = vpack.c.bf16 %v379_v40, %v363_v55 }
 0x126   :  { %v378_v43 = vsel %vm358_vm8, %v374_v37, %v368_v12  ;;  %v375_v45 = vsel %vm358_vm8, %v372_v39, %v374_v37  ;;  %v376_v46 = vsel %vm358_vm8, %v370_v9, %v372_v39 }
 0x127   :  { %v382_v51 = vmul.f32 %v378_v43, %v1986_v13  ;;  %v380_v52 = vmul.f32 %v376_v46, %v1990_v17  ;;  %v381_v54 = vmul.f32 %v375_v45, %v1996_v21 }
 0x129   :  { %v1253_v3 = vpack.c.bf16 %v380_v52, %v364_v35  ;;  %v1289_v4 = vpack.c.bf16 %v382_v51, %v366_v32  ;;  %v1291_v56 = vpack.c.bf16 %v381_v54, %v365_v48  ;;  %v1506_v32 = vmov 0.0   ;;  %v670_v35 = vld [vmem:[%s2404_s6] sm:$0xff] }
 0x12b   :  { %1254 = vmatprep.subr.bf16.mxu0 %v1253_v3  ;;  %1290 = vmatprep.subr.bf16.mxu1 %v1289_v4 }
 0x12c   :  { %1256 = vmatpush1.bf16.msra.mxu0 %v1255_v6  ;;  %1292 = vmatpush1.bf16.msra.mxu1 %v1291_v56 }
 0x12f   :  { %460 = vmatmul.mubr.f32.vlgmr.msra.gmra.mrb[0].mxu0 %v383_v5  ;;  %531 = vmatmul.mubr.f32.vlgmr.msra.gmra.mrb[0].mxu1 %v383_v5 }
 0x130   :  { %744 = vmatprep.mubr.f32.mxu0 %v1506_v32  ;;  %815 = vmatprep.mubr.f32.mxu1 %v1506_v32 }
 0x136   :  { %v389_v0 = vpop.permute.xlu0 %388 }
 0x202   :  { %v461_v58 = vpop.f32.mrb[0].mxu0  ;;  %v532_v61 = vpop.f32.mrb[0].mxu1 }
 0x203   :  { %v462_v62 = vadd.f32 %v461_v58, %v389_v0  ;;  %v533_v63 = vadd.f32 %v532_v61, %v389_v0  ;;  %v463_v8 = vpop.f32.mrb[1].mxu0  ;;  %v534_v9 = vpop.f32.mrb[1].mxu1 }
 0x204   :  { %v464_v18 = vadd.f32 %v463_v8, %v389_v0  ;;  %v535_v24 = vadd.f32 %v534_v9, %v389_v0 }
 0x205   :  { %v2021_v12 = vmax.f32 %v462_v62, 0.0  ;;  %v2023_v14 = vmax.f32 %v533_v63, 0.0 }
 0x206   :  { %v2029_v19 = vmax.f32 %v464_v18, 0.0  ;;  %v2035_v31 = vmax.f32 %v535_v24, 0.0 }
 0x207   :  { %545 = vrot.lane.b32.xlu0 %v2023_v14, %s1497_s24  ;;  %541 = vrot.lane.b32.xlu1 %v2021_v12, %s1497_s24 }
 0x20b   :  { %557 = vrot.lane.b32.xlu0 %v2021_v12, %s1498_s2  ;;  %543 = vrot.lane.b32.xlu1 %v2029_v19, %s1497_s24 }
 0x20f   :  { %561 = vrot.lane.b32.xlu0 %v2023_v14, %s1498_s2  ;;  %547 = vrot.lane.b32.xlu1 %v2035_v31, %s1497_s24 }
 0x213   :  { %573 = vrot.lane.b32.xlu0 %v2021_v12, %s1499_s25  ;;  %559 = vrot.lane.b32.xlu1 %v2029_v19, %s1498_s2 }
 0x217   :  { %577 = vrot.lane.b32.xlu0 %v2023_v14, %s1499_s25  ;;  %563 = vrot.lane.b32.xlu1 %v2035_v31, %s1498_s2 }
 0x21b   :  { %589 = vrot.lane.b32.xlu0 %v2021_v12, %s1500_s26  ;;  %575 = vrot.lane.b32.xlu1 %v2029_v19, %s1499_s25 }
 0x21f   :  { %593 = vrot.lane.b32.xlu0 %v2023_v14, %s1500_s26  ;;  %579 = vrot.lane.b32.xlu1 %v2035_v31, %s1499_s25 }
 0x223   :  { %605 = vrot.lane.b32.xlu0 %v2021_v12, %s1501_s27  ;;  %591 = vrot.lane.b32.xlu1 %v2029_v19, %s1500_s26 }
 0x227   :  { %609 = vrot.lane.b32.xlu0 %v2023_v14, %s1501_s27  ;;  %595 = vrot.lane.b32.xlu1 %v2035_v31, %s1500_s26 }
 0x22b   :  { %621 = vrot.lane.b32.xlu0 %v2021_v12, %s1502_s28  ;;  %607 = vrot.lane.b32.xlu1 %v2029_v19, %s1501_s27 }
 0x22f   :  { %625 = vrot.lane.b32.xlu0 %v2023_v14, %s1502_s28  ;;  %611 = vrot.lane.b32.xlu1 %v2035_v31, %s1501_s27 }
 0x233   :  { %637 = vrot.lane.b32.xlu0 %v2021_v12, %s1503_s29  ;;  %623 = vrot.lane.b32.xlu1 %v2029_v19, %s1502_s28 }
 0x237   :  { %641 = vrot.lane.b32.xlu0 %v2023_v14, %s1503_s29  ;;  %627 = vrot.lane.b32.xlu1 %v2035_v31, %s1502_s28 }
 0x23b   :  { %653 = vrot.lane.b32.xlu0 %v2021_v12, %s1504_s30  ;;  %639 = vrot.lane.b32.xlu1 %v2029_v19, %s1503_s29 }
 0x23f   :  { %657 = vrot.lane.b32.xlu0 %v2023_v14, %s1504_s30  ;;  %643 = vrot.lane.b32.xlu1 %v2035_v31, %s1503_s29 }
 0x243   :  { %673 = vperm.xlu0 %1373, %v670_v35   ;;  %655 = vrot.lane.b32.xlu1 %v2029_v19, %s1504_s30 }
 0x247   :  { %659 = vrot.lane.b32.xlu1 %v2035_v31, %s1504_s30 }
 0x279   :  { %v546_v37 = vpop.permute.xlu0 %545  ;;  %v542_v39 = vpop.permute.xlu1 %541 }
 0x27d   :  { %v558_v40 = vpop.permute.xlu0 %557  ;;  %v544_v43 = vpop.permute.xlu1 %543 }
 0x27e   :  { %v551_v48 = vsel %vm127_vm1, %v542_v39, %v544_v43  ;;  %v550_v5 = vsel %vm127_vm1, %v544_v43, %v546_v37 }
 0x27f   :  { %v554_v55 = vmul.f32 %v551_v48, %v1740_v15  ;;  %v555_v35 = vmul.f32 %v550_v5, %v1762_v28 }
 0x281   :  { %v562_v45 = vpop.permute.xlu0 %561  ;;  %v548_v46 = vpop.permute.xlu1 %547 }
 0x282   :  { %v549_v56 = vsel %vm127_vm1, %v546_v37, %v548_v46  ;;  %v552_v6 = vsel %vm127_vm1, %v548_v46, %v542_v39 }
 0x283   :  { %v553_v8 = vmul.f32 %v552_v6, %v1748_v22  ;;  %v556_v9 = vmul.f32 %v549_v56, %v1750_v23 }
 0x285   :  { %v574_v51 = vpop.permute.xlu0 %573  ;;  %v560_v52 = vpop.permute.xlu1 %559 }
 0x286   :  { %v567_v54 = vsel %vm160_vm2, %v558_v40, %v560_v52  ;;  %v566_v3 = vsel %vm160_vm2, %v560_v52, %v562_v45 }
 0x287   :  { %v570_v4 = vmul.f32 %v567_v54, %v1780_v49  ;;  %v571_v62 = vmul.f32 %v566_v3, %v1791_v57 }
 0x289   :  { %v578_v0 = vpop.permute.xlu0 %577  ;;  %v564_v58 = vpop.permute.xlu1 %563  ;;  %v1293_v61 = vpack.c.bf16 %v570_v4, %v554_v55  ;;  %v1311_v48 = vpack.c.bf16 %v571_v62, %v555_v35 }
 0x28a   :  { %v565_v15 = vsel %vm160_vm2, %v562_v45, %v564_v58  ;;  %v568_v63 = vsel %vm160_vm2, %v564_v58, %v558_v40 }
 0x28b   :  { %v569_v18 = vmul.f32 %v568_v63, %v1784_v53  ;;  %v572_v24 = vmul.f32 %v565_v15, %v1796_v60  ;;  %1294 = vmatprep.subr.bf16.mxu0 %v1293_v61 }
 0x28d   :  { %v1295_v37 = vpack.c.bf16 %v569_v18, %v553_v8  ;;  %v590_v39 = vpop.permute.xlu0 %589  ;;  %v576_v43 = vpop.permute.xlu1 %575  ;;  %v1309_v46 = vpack.c.bf16 %v572_v24, %v556_v9 }
 0x28e   :  { %v583_v22 = vsel %vm193_vm3, %v574_v51, %v576_v43  ;;  %v582_v4 = vsel %vm193_vm3, %v576_v43, %v578_v0 }
 0x28f   :  { %1296 = vmatpush1.bf16.msra.mxu0 %v1295_v37  ;;  %1310 = vmatprep.subr.bf16.mxu1 %v1309_v46  ;;  %v586_v28 = vmul.f32 %v583_v22, %v1813_v30 }
 0x290   :  { %1312 = vmatpush1.bf16.msra.mxu1 %v1311_v48 }
 0x291   :  { %v594_v40 = vpop.permute.xlu0 %593  ;;  %v580_v45 = vpop.permute.xlu1 %579 }
 0x292   :  { %v581_v55 = vsel %vm193_vm3, %v578_v0, %v580_v45  ;;  %v584_v3 = vsel %vm193_vm3, %v580_v45, %v574_v51  ;;  %v587_v0 = vmul.f32 %v582_v4, %v1824_v38 }
 0x293   :  { %v585_v15 = vmul.f32 %v584_v3, %v1817_v34  ;;  %v588_v63 = vmul.f32 %v581_v55, %v1829_v41 }
 0x295   :  { %v606_v23 = vpop.permute.xlu0 %605  ;;  %v592_v53 = vpop.permute.xlu1 %591 }
 0x296   :  { %v599_v60 = vsel %vm226_vm4, %v590_v39, %v592_v53  ;;  %v598_v52 = vsel %vm226_vm4, %v592_v53, %v594_v40 }
 0x297   :  { %v602_v54 = vmul.f32 %v599_v60, %v1846_v10  ;;  %v603_v58 = vmul.f32 %v598_v52, %v1857_v20 }
 0x299   :  { %v610_v56 = vpop.permute.xlu0 %609  ;;  %v596_v6 = vpop.permute.xlu1 %595  ;;  %v1297_v5 = vpack.c.bf16 %v602_v54, %v586_v28  ;;  %v1315_v37 = vpack.c.bf16 %v603_v58, %v587_v0 }
 0x29a   :  { %v597_v61 = vsel %vm226_vm4, %v594_v40, %v596_v6  ;;  %v600_v62 = vsel %vm226_vm4, %v596_v6, %v590_v39 }
 0x29b   :  { %v601_v51 = vmul.f32 %v600_v62, %v1850_v16  ;;  %v604_v8 = vmul.f32 %v597_v61, %v1862_v25  ;;  %1298 = vmatprep.subr.bf16.mxu0 %v1297_v5 }
 0x29d   :  { %v1299_v9 = vpack.c.bf16 %v601_v51, %v585_v15  ;;  %v622_v18 = vpop.permute.xlu0 %621  ;;  %v608_v24 = vpop.permute.xlu1 %607  ;;  %v1313_v35 = vpack.c.bf16 %v604_v8, %v588_v63 }
 0x29e   :  { %v614_v43 = vsel %vm259_vm5, %v608_v24, %v610_v56  ;;  %v615_v39 = vsel %vm259_vm5, %v606_v23, %v608_v24 }
 0x29f   :  { %v617_v46 = vmul.f32 %v615_v39, %v1901_v59  ;;  %v618_v48 = vmul.f32 %v614_v43, %v1891_v1  ;;  %1300 = vmatpush1.bf16.msra.mxu0 %v1299_v9  ;;  %1314 = vmatprep.subr.bf16.mxu1 %v1313_v35 }
 0x2a0   :  { %1316 = vmatpush1.bf16.msra.mxu1 %v1315_v37 }
 0x2a1   :  { %v1303_v38 = vpack.c.bf16 %v617_v46, %v2021_v12  ;;  %v626_v40 = vpop.permute.xlu0 %625  ;;  %v612_v45 = vpop.permute.xlu1 %611  ;;  %v1301_v22 = vpack.c.bf16 %v618_v48, %v2029_v19 }
 0x2a2   :  { %v613_v53 = vsel %vm259_vm5, %v610_v56, %v612_v45  ;;  %v616_v60 = vsel %vm259_vm5, %v612_v45, %v606_v23 }
 0x2a3   :  { %v619_v28 = vmul.f32 %v613_v53, %v1897_v7  ;;  %v620_v52 = vmul.f32 %v616_v60, %v1887_v2  ;;  %1302 = vmatprep.subr.bf16.mxu0 %v1301_v22 }
 0x2a4   :  { %1304 = vmatpush1.bf16.msra.mxu0 %v1303_v38 }
 0x2a5   :  { %v1319_v54 = vpack.c.bf16 %v619_v28, %v2023_v14  ;;  %v638_v55 = vpop.permute.xlu0 %637  ;;  %v624_v12 = vpop.permute.xlu1 %623  ;;  %v1317_v3 = vpack.c.bf16 %v620_v52, %v2035_v31  ;;  %v669_v28 = vld [vmem:[%s2403_s5] sm:$0xff] }
 0x2a6   :  { %v630_v56 = vsel %vm292_vm6, %v624_v12, %v626_v40  ;;  %v631_v23 = vsel %vm292_vm6, %v622_v18, %v624_v12 }
 0x2a7   :  { %1318 = vmatprep.subr.bf16.mxu1 %v1317_v3  ;;  %v633_v58 = vmul.f32 %v631_v23, %v1934_v50  ;;  %v634_v31 = vmul.f32 %v630_v56, %v1924_v44 }
 0x2a8   :  { %1320 = vmatpush1.bf16.msra.mxu1 %v1319_v54 }
 0x2a9   :  { %v642_v19 = vpop.permute.xlu0 %641  ;;  %v628_v4 = vpop.permute.xlu1 %627 }
 0x2aa   :  { %v629_v63 = vsel %vm292_vm6, %v626_v40, %v628_v4  ;;  %v632_v51 = vsel %vm292_vm6, %v628_v4, %v622_v18 }
 0x2ab   :  { %v635_v37 = vmul.f32 %v629_v63, %v1930_v47  ;;  %v636_v43 = vmul.f32 %v632_v51, %v1920_v42  ;;  %v955_v63 = vld [vmem:[%s2406_s8] sm:$0xff] }
 0x2ad   :  { %v640_v6 = vpop.permute.xlu1 %639  ;;  %v654_v61 = vpop.permute.xlu0 %653 }
 0x2ae   :  { %v646_v5 = vsel %vm325_vm7, %v640_v6, %v642_v19  ;;  %v647_v14 = vsel %vm325_vm7, %v638_v55, %v640_v6 }
 0x2af   :  { %v649_v62 = vmul.f32 %v647_v14, %v1967_v36  ;;  %v650_v15 = vmul.f32 %v646_v5, %v1957_v29 }
 0x2b1   :  { %v1307_v8 = vpack.c.bf16 %v649_v62, %v633_v58  ;;  %v644_v0 = vpop.permute.xlu1 %643  ;;  %v1305_v9 = vpack.c.bf16 %v650_v15, %v634_v31  ;;  %v658_v18 = vpop.permute.xlu0 %657 }
 0x2b2   :  { %v645_v24 = vsel %vm325_vm7, %v642_v19, %v644_v0  ;;  %v648_v35 = vsel %vm325_vm7, %v644_v0, %v638_v55 }
 0x2b3   :  { %v651_v39 = vmul.f32 %v645_v24, %v1963_v33  ;;  %v652_v46 = vmul.f32 %v648_v35, %v1953_v26  ;;  %1306 = vmatprep.subr.bf16.mxu0 %v1305_v9 }
 0x2b4   :  { %1308 = vmatpush1.bf16.msra.mxu0 %v1307_v8 }
 0x2b5   :  { %v1323_v48 = vpack.c.bf16 %v651_v39, %v635_v37  ;;  %v656_v38 = vpop.permute.xlu1 %655  ;;  %v1321_v40 = vpack.c.bf16 %v652_v46, %v636_v43  ;;  %v1391_v39 = vld [vmem:[#allocation7 + $0x8] sm:$0xff] }
 0x2b6   :  { %v662_v45 = vsel %vm358_vm8, %v656_v38, %v658_v18  ;;  %v663_v22 = vsel %vm358_vm8, %v654_v61, %v656_v38 }
 0x2b7   :  { %v665_v53 = vmul.f32 %v663_v22, %v2000_v27  ;;  %v666_v60 = vmul.f32 %v662_v45, %v1990_v17  ;;  %1322 = vmatprep.subr.bf16.mxu1 %v1321_v40 }
 0x2b8   :  { %1324 = vmatpush1.bf16.msra.mxu1 %v1323_v48 }
 0x2b9   :  { %696 = vmatprep.subr.mxu0 %v666_v60  ;;  %v660_v52 = vpop.permute.xlu1 %659 }
 0x2ba   :  { %v661_v54 = vsel %vm358_vm8, %v658_v18, %v660_v52  ;;  %v664_v55 = vsel %vm358_vm8, %v660_v52, %v654_v61  ;;  %697 = vmatpush1.msra.mxu0 %v665_v53 }
 0x2bb   :  { %v667_v12 = vmul.f32 %v661_v54, %v1996_v21  ;;  %v668_v3 = vmul.f32 %v664_v55, %v1986_v13  ;;  %1217 = vmatmul.mubr.msk.f32.vlgmr.msra.gmra.mrb[2].mxu0 %vm676_vm9, %v669_v28  ;;  %v1392_v54 = vld [vmem:[#allocation7] sm:$0xff] }
 0x2bc   :  { %1028 = vmatprep.mubr.f32.mxu0 %v1506_v32 }
 0x2bd   :  { %767 = vmatprep.subr.mxu1 %v668_v3 }
 0x2be   :  { %768 = vmatpush1.msra.mxu1 %v667_v12  ;;  %v1393_v12 = vld [vmem:[#allocation7 + $0x18] sm:$0xff] }
 0x2bf   :  { %1218 = vmatmul.mubr.msk.f32.vlgmr.msra.gmra.mrb[2].mxu1 %vm676_vm9, %v669_v28 }
 0x2c0   :  { %1099 = vmatprep.mubr.f32.mxu1 %v1506_v32 }
 0x2c2   :  { %v674_v19 = vpop.permute.xlu0 %673 }
 0x38e   :  { %v746_v4 = vpop.f32.mrb[2].mxu0 }
 0x38f   :  { %v747_v56 = vadd.f32 %v746_v4, %v674_v19  ;;  %v748_v23 = vpop.f32.mrb[3].mxu0 }
 0x390   :  { %v749_v6 = vadd.f32 %v748_v23, %v674_v19 }
 0x391   :  { %v2205_v5 = vmax.f32 %v747_v56, 0.0  ;;  %v1395_v56 = vld [vmem:[#allocation7 + $0x38] sm:$0xff] }
 0x392   :  { %v2207_v14 = vmax.f32 %v749_v6, 0.0  ;;  %v817_v58 = vpop.f32.mrb[2].mxu1  ;;  %v1396_v6 = vld [vmem:[#allocation7 + $0x10] sm:$0xff] }
 0x393   :  { %v818_v31 = vadd.f32 %v817_v58, %v674_v19  ;;  %826 = vrot.lane.b32.xlu1 %v2205_v5, %s1497_s24  ;;  %v819_v61 = vpop.f32.mrb[3].mxu1 }
 0x394   :  { %v820_v62 = vadd.f32 %v819_v61, %v674_v19  ;;  %828 = vrot.lane.b32.xlu0 %v2207_v14, %s1497_s24  ;;  %v1394_v19 = vld [vmem:[#allocation7 + $0x20] sm:$0xff] }
 0x395   :  { %v2213_v32 = vmax.f32 %v818_v31, 0.0 }
 0x396   :  { %v2215_v15 = vmax.f32 %v820_v62, 0.0 }
 0x397   :  { %830 = vrot.lane.b32.xlu1 %v2213_v32, %s1497_s24 }
 0x398   :  { %832 = vrot.lane.b32.xlu0 %v2215_v15, %s1497_s24 }
 0x39b   :  { %842 = vrot.lane.b32.xlu1 %v2205_v5, %s1498_s2 }
 0x39c   :  { %844 = vrot.lane.b32.xlu0 %v2207_v14, %s1498_s2 }
 0x39f   :  { %846 = vrot.lane.b32.xlu1 %v2213_v32, %s1498_s2 }
 0x3a0   :  { %848 = vrot.lane.b32.xlu0 %v2215_v15, %s1498_s2 }
 0x3a3   :  { %858 = vrot.lane.b32.xlu1 %v2205_v5, %s1499_s25 }
 0x3a4   :  { %860 = vrot.lane.b32.xlu0 %v2207_v14, %s1499_s25 }
 0x3a7   :  { %862 = vrot.lane.b32.xlu1 %v2213_v32, %s1499_s25 }
 0x3a8   :  { %864 = vrot.lane.b32.xlu0 %v2215_v15, %s1499_s25 }
 0x3ab   :  { %874 = vrot.lane.b32.xlu1 %v2205_v5, %s1500_s26 }
 0x3ac   :  { %876 = vrot.lane.b32.xlu0 %v2207_v14, %s1500_s26 }
 0x3af   :  { %878 = vrot.lane.b32.xlu1 %v2213_v32, %s1500_s26 }
 0x3b0   :  { %880 = vrot.lane.b32.xlu0 %v2215_v15, %s1500_s26 }
 0x3b3   :  { %890 = vrot.lane.b32.xlu1 %v2205_v5, %s1501_s27 }
 0x3b4   :  { %892 = vrot.lane.b32.xlu0 %v2207_v14, %s1501_s27 }
 0x3b7   :  { %894 = vrot.lane.b32.xlu1 %v2213_v32, %s1501_s27 }
 0x3b8   :  { %896 = vrot.lane.b32.xlu0 %v2215_v15, %s1501_s27 }
 0x3bb   :  { %906 = vrot.lane.b32.xlu1 %v2205_v5, %s1502_s28 }
 0x3bc   :  { %908 = vrot.lane.b32.xlu0 %v2207_v14, %s1502_s28 }
 0x3bf   :  { %910 = vrot.lane.b32.xlu1 %v2213_v32, %s1502_s28 }
 0x3c0   :  { %912 = vrot.lane.b32.xlu0 %v2215_v15, %s1502_s28 }
 0x3c3   :  { %922 = vrot.lane.b32.xlu1 %v2205_v5, %s1503_s29 }
 0x3c4   :  { %924 = vrot.lane.b32.xlu0 %v2207_v14, %s1503_s29 }
 0x3c7   :  { %926 = vrot.lane.b32.xlu1 %v2213_v32, %s1503_s29 }
 0x3c8   :  { %928 = vrot.lane.b32.xlu0 %v2215_v15, %s1503_s29 }
 0x3cb   :  { %938 = vrot.lane.b32.xlu1 %v2205_v5, %s1504_s30 }
 0x3cc   :  { %940 = vrot.lane.b32.xlu0 %v2207_v14, %s1504_s30 }
 0x3cf   :  { %942 = vrot.lane.b32.xlu1 %v2213_v32, %s1504_s30 }
 0x3d0   :  { %944 = vrot.lane.b32.xlu0 %v2215_v15, %s1504_s30 }
 0x3d3   :  { %958 = vperm.xlu1 %1374, %v955_v63  }
 0x405   :  { %v827_v51 = vpop.permute.xlu1 %826 }
 0x406   :  { %v829_v8 = vpop.permute.xlu0 %828 }
 0x407   :  { %v836_v24 = vsel %vm127_vm1, %v827_v51, %v829_v8 }
 0x408   :  { %v839_v46 = vmul.f32 %v1391_v39, %v836_v24 }
 0x409   :  { %v831_v0 = vpop.permute.xlu1 %830 }
 0x40a   :  { %v833_v9 = vpop.permute.xlu0 %832  ;;  %v835_v45 = vsel %vm127_vm1, %v829_v8, %v831_v0 }
 0x40b   :  { %v834_v48 = vsel %vm127_vm1, %v831_v0, %v833_v9  ;;  %v837_v38 = vsel %vm127_vm1, %v833_v9, %v827_v51  ;;  %v840_v58 = vmul.f32 %v1396_v6, %v835_v45 }
 0x40c   :  { %v838_v55 = vmul.f32 %v1392_v54, %v837_v38  ;;  %v841_v3 = vmul.f32 %v1393_v12, %v834_v48 }
 0x40d   :  { %v843_v35 = vpop.permute.xlu1 %842 }
 0x40e   :  { %v845_v37 = vpop.permute.xlu0 %844 }
 0x40f   :  { %v852_v43 = vsel %vm160_vm2, %v843_v35, %v845_v37 }
 0x410   :  { %v855_v18 = vmul.f32 %v852_v43, %v1780_v49 }
 0x411   :  { %v847_v40 = vpop.permute.xlu1 %846 }
 0x412   :  { %v851_v22 = vsel %vm160_vm2, %v845_v37, %v847_v40  ;;  %v849_v53 = vpop.permute.xlu0 %848  ;;  %v1325_v60 = vpack.c.bf16 %v855_v18, %v839_v46 }
 0x413   :  { %v856_v28 = vmul.f32 %v851_v22, %v1791_v57  ;;  %v850_v49 = vsel %vm160_vm2, %v847_v40, %v849_v53  ;;  %v853_v52 = vsel %vm160_vm2, %v849_v53, %v843_v35 }
 0x414   :  { %v854_v4 = vmul.f32 %v1394_v19, %v853_v52  ;;  %v857_v23 = vmul.f32 %v1395_v56, %v850_v49  ;;  %1326 = vmatprep.subr.bf16.mxu0 %v1325_v60  ;;  %v1397_v52 = vld [vmem:[#allocation7 + $0x50] sm:$0xff] }
 0x415   :  { %v859_v31 = vpop.permute.xlu1 %858  ;;  %v1343_v63 = vpack.c.bf16 %v856_v28, %v840_v58 }
 0x416   :  { %v1327_v61 = vpack.c.bf16 %v854_v4, %v838_v55  ;;  %v861_v57 = vpop.permute.xlu0 %860  ;;  %v1341_v62 = vpack.c.bf16 %v857_v23, %v841_v3 }
 0x417   :  { %v868_v0 = vsel %vm193_vm3, %v859_v31, %v861_v57 }
 0x418   :  { %1328 = vmatpush1.bf16.msra.mxu0 %v1327_v61  ;;  %1342 = vmatprep.subr.bf16.mxu1 %v1341_v62  ;;  %v871_v37 = vmul.f32 %v868_v0, %v1813_v30 }
 0x419   :  { %1344 = vmatpush1.bf16.msra.mxu1 %v1343_v63  ;;  %v863_v51 = vpop.permute.xlu1 %862 }
 0x41a   :  { %v865_v8 = vpop.permute.xlu0 %864  ;;  %v867_v48 = vsel %vm193_vm3, %v861_v57, %v863_v51 }
 0x41b   :  { %v866_v39 = vsel %vm193_vm3, %v863_v51, %v865_v8  ;;  %v869_v46 = vsel %vm193_vm3, %v865_v8, %v859_v31  ;;  %v872_v54 = vmul.f32 %v1397_v52, %v867_v48 }
 0x41c   :  { %v870_v53 = vmul.f32 %v869_v46, %v1817_v34  ;;  %v873_v60 = vmul.f32 %v866_v39, %v1829_v41 }
 0x41d   :  { %v875_v9 = vpop.permute.xlu1 %874 }
 0x41e   :  { %v877_v24 = vpop.permute.xlu0 %876 }
 0x41f   :  { %v884_v35 = vsel %vm226_vm4, %v875_v9, %v877_v24 }
 0x420   :  { %v887_v43 = vmul.f32 %v884_v35, %v1846_v10 }
 0x421   :  { %v879_v18 = vpop.permute.xlu1 %878 }
 0x422   :  { %v883_v38 = vsel %vm226_vm4, %v877_v24, %v879_v18  ;;  %v881_v40 = vpop.permute.xlu0 %880  ;;  %v1329_v45 = vpack.c.bf16 %v887_v43, %v871_v37 }
 0x423   :  { %v888_v22 = vmul.f32 %v883_v38, %v1857_v20  ;;  %v882_v30 = vsel %vm226_vm4, %v879_v18, %v881_v40  ;;  %v885_v10 = vsel %vm226_vm4, %v881_v40, %v875_v9 }
 0x424   :  { %v886_v28 = vmul.f32 %v885_v10, %v1850_v16  ;;  %v889_v49 = vmul.f32 %v882_v30, %v1862_v25  ;;  %1330 = vmatprep.subr.bf16.mxu0 %v1329_v45 }
 0x425   :  { %v891_v55 = vpop.permute.xlu1 %890  ;;  %v1347_v19 = vpack.c.bf16 %v888_v22, %v872_v54 }
 0x426   :  { %v1331_v12 = vpack.c.bf16 %v886_v28, %v870_v53  ;;  %v893_v20 = vpop.permute.xlu0 %892  ;;  %v1345_v3 = vpack.c.bf16 %v889_v49, %v873_v60 }
 0x427   :  { %v900_v4 = vsel %vm259_vm5, %v891_v55, %v893_v20 }
 0x428   :  { %1332 = vmatpush1.bf16.msra.mxu0 %v1331_v12  ;;  %1346 = vmatprep.subr.bf16.mxu1 %v1345_v3  ;;  %v902_v41 = vmul.f32 %v900_v4, %v1901_v59 }
 0x429   :  { %1348 = vmatpush1.bf16.msra.mxu1 %v1347_v19  ;;  %v895_v34 = vpop.permute.xlu1 %894 }
 0x42a   :  { %v899_v16 = vsel %vm259_vm5, %v893_v20, %v895_v34  ;;  %v897_v25 = vpop.permute.xlu0 %896  ;;  %v1335_v59 = vpack.c.bf16 %v902_v41, %v2205_v5 }
 0x42b   :  { %v903_v56 = vmul.f32 %v899_v16, %v1891_v1  ;;  %v898_v23 = vsel %vm259_vm5, %v895_v34, %v897_v25  ;;  %v901_v6 = vsel %vm259_vm5, %v897_v25, %v891_v55  ;;  %v954_v55 = vld [vmem:[%s2405_s7] sm:$0xff]  ;;  %s1507_s7 = smov [#allocation8]  }
 0x42c   :  { %v904_v58 = vmul.f32 %v898_v23, %v1897_v7  ;;  %v905_v31 = vmul.f32 %v901_v6, %v1887_v2  ;;  %s1205_s19 = sshll.u32 %s1507_s7, 4  ;;  %s1206_s19 = int_to_ptr.vmem [resolvable:$true] %s1205_s19 }
 0x42d   :  { %v907_v61 = vpop.permute.xlu1 %906  ;;  %v1333_v57 = vpack.c.bf16 %v903_v56, %v2207_v14  ;;  %s1464_s20 = scalar_lea.vmem %s1206_s19, 512  ;;  %p1469_p11 = scmp.lt.s32.totalorder %s1206_s19, %s1206_s19 }
 0x42e   :  { %v1351_v62 = vpack.c.bf16 %v904_v58, %v2213_v32  ;;  %v909_v63 = vpop.permute.xlu0 %908  ;;  %v1349_v1 = vpack.c.bf16 %v905_v31, %v2215_v15  ;;  %p1465_p10 = scmp.ne.s32.totalorder %s1206_s19, %s1464_s20  ;;  %p1470_p12 = scmp.lt.s32.totalorder %s1464_s20, %s1464_s20 }
 0x42f   :  { %1334 = vmatprep.subr.bf16.mxu0 %v1333_v57  ;;  %v916_v2 = vsel %vm292_vm6, %v907_v61, %v909_v63 }
 0x430   :  { %1336 = vmatpush1.bf16.msra.mxu0 %v1335_v59  ;;  %1350 = vmatprep.subr.bf16.mxu1 %v1349_v1  ;;  %v918_v24 = vmul.f32 %v916_v2, %v1934_v50  ;;  %p1471_p13 = por %p1470_p12, %p1469_p11 }
 0x431   :  { %1352 = vmatpush1.bf16.msra.mxu1 %v1351_v62  ;;  %v911_v51 = vpop.permute.xlu1 %910 }
 0x432   :  { %v913_v8 = vpop.permute.xlu0 %912  ;;  %v915_v5 = vsel %vm292_vm6, %v909_v63, %v911_v51  ;;  %p1472_p0 = pnand %p1471_p13, %p1465_p10 }
 0x433   :  { %v914_v32 = vsel %vm292_vm6, %v911_v51, %v913_v8  ;;  %v917_v15 = vsel %vm292_vm6, %v913_v8, %v907_v61  ;;  %v919_v39 = vmul.f32 %v915_v5, %v1924_v44 }
 0x434   :  { %v920_v38 = vmul.f32 %v914_v32, %v1930_v47  ;;  %v921_v50 = vmul.f32 %v917_v15, %v1920_v42 }
 0x435   :  { %v923_v0 = vpop.permute.xlu1 %922 }
 0x436   :  { %v925_v7 = vpop.permute.xlu0 %924 }
 0x437   :  { %v932_v14 = vsel %vm325_vm7, %v923_v0, %v925_v7 }
 0x438   :  { %v934_v35 = vmul.f32 %v932_v14, %v1967_v36 }
 0x439   :  { %v927_v9 = vpop.permute.xlu1 %926 }
 0x43a   :  { %v931_v37 = vsel %vm325_vm7, %v925_v7, %v927_v9  ;;  %v929_v43 = vpop.permute.xlu0 %928  ;;  %v1339_v30 = vpack.c.bf16 %v934_v35, %v918_v24 }
 0x43b   :  { %v935_v46 = vmul.f32 %v931_v37, %v1957_v29  ;;  %v930_v18 = vsel %vm325_vm7, %v927_v9, %v929_v43  ;;  %v933_v48 = vsel %vm325_vm7, %v929_v43, %v923_v0 }
 0x43c   :  { %v936_v36 = vmul.f32 %v930_v18, %v1963_v33  ;;  %v937_v40 = vmul.f32 %v933_v48, %v1953_v26 }
 0x43d   :  { %v939_v45 = vpop.permute.xlu1 %938  ;;  %v1337_v22 = vpack.c.bf16 %v935_v46, %v919_v39 }
 0x43e   :  { %v1355_v44 = vpack.c.bf16 %v936_v36, %v920_v38  ;;  %v941_v10 = vpop.permute.xlu0 %940  ;;  %v1353_v29 = vpack.c.bf16 %v937_v40, %v921_v50 }
 0x43f   :  { %1338 = vmatprep.subr.bf16.mxu0 %v1337_v22  ;;  %v948_v53 = vsel %vm358_vm8, %v939_v45, %v941_v10 }
 0x440   :  { %1340 = vmatpush1.bf16.msra.mxu0 %v1339_v30  ;;  %1354 = vmatprep.subr.bf16.mxu1 %v1353_v29  ;;  %v950_v49 = vmul.f32 %v948_v53, %v2000_v27 }
 0x441   :  { %1356 = vmatpush1.bf16.msra.mxu1 %v1355_v44  ;;  %v943_v47 = vpop.permute.xlu1 %942 }
 0x442   :  { %v947_v42 = vsel %vm358_vm8, %v941_v10, %v943_v47  ;;  %v945_v33 = vpop.permute.xlu0 %944 }
 0x443   :  { %v951_v26 = vmul.f32 %v947_v42, %v1990_v17  ;;  %v946_v60 = vsel %vm358_vm8, %v943_v47, %v945_v33  ;;  %v949_v28 = vsel %vm358_vm8, %v945_v33, %v939_v45 }
 0x444   :  { %v952_v52 = vmul.f32 %v946_v60, %v1996_v21  ;;  %v953_v54 = vmul.f32 %v949_v28, %v1986_v13 }
 0x445   :  { %980 = vmatprep.subr.mxu0 %v951_v26 }
 0x446   :  { %981 = vmatpush1.msra.mxu0 %v950_v49  ;;  %1051 = vmatprep.subr.mxu1 %v953_v54 }
 0x447   :  { %1219 = vmatmul.mubr.msk.f32.vlgmr.msra.gmra.mrb[4].mxu0 %vm676_vm9, %v954_v55  ;;  %1052 = vmatpush1.msra.mxu1 %v952_v52 }
 0x448   :  { %1220 = vmatmul.mubr.msk.f32.vlgmr.msra.gmra.mrb[4].mxu1 %vm676_vm9, %v954_v55 }
 0x452   :  { %v959_v11 = vpop.permute.xlu1 %958 }
 0x51a   :  { %v1030_v17 = vpop.f32.mrb[4].mxu0 }
 0x51b   :  { %v1031_v27 = vadd.f32 %v1030_v17, %v959_v11  ;;  %v1032_v12 = vpop.f32.mrb[5].mxu0  ;;  %v1101_v21 = vpop.f32.mrb[4].mxu1 }
 0x51c   :  { %v1033_v20 = vadd.f32 %v1032_v12, %v959_v11  ;;  %v1102_v13 = vadd.f32 %v1101_v21, %v959_v11  ;;  %v1103_v3 = vpop.f32.mrb[5].mxu1 }
 0x51d   :  { %v1107_v19 = vsel %vm1106_vm10, %v1031_v27, -inf  ;;  %v1104_v4 = vadd.f32 %v1103_v3, %v959_v11 }
 0x51e   :  { %v1108_v34 = vrot.slane %v1107_v19, 4  ;;  %v1114_v41 = vsel %vm1106_vm10, %v1033_v20, -inf  ;;  %v1121_v16 = vsel %vm1106_vm10, %v1102_v13, -inf }
 0x51f   :  { %v1115_v25 = vrot.slane %v1114_v41, 4  ;;  %v1122_v56 = vrot.slane %v1121_v16, 4  ;;  %v1128_v23 = vsel %vm1106_vm10, %v1104_v4, -inf }
 0x520   :  { %v1109_v6 = vmax.f32 %v1107_v19, %v1108_v34  ;;  %v1129_v58 = vrot.slane %v1128_v23, 4 }
 0x521   :  { %v1116_v31 = vmax.f32 %v1114_v41, %v1115_v25  ;;  %v1123_v61 = vmax.f32 %v1121_v16, %v1122_v56 }
 0x522   :  { %v1110_v57 = vrot.slane %v1109_v6, 2  ;;  %v1130_v59 = vmax.f32 %v1128_v23, %v1129_v58 }
 0x523   :  { %v1117_v62 = vrot.slane %v1116_v31, 2  ;;  %v1124_v63 = vrot.slane %v1123_v61, 2 }
 0x524   :  { %v1111_v1 = vmax.f32 %v1109_v6, %v1110_v57  ;;  %v1131_v51 = vrot.slane %v1130_v59, 2 }
 0x525   :  { %v1118_v8 = vmax.f32 %v1116_v31, %v1117_v62  ;;  %v1125_v0 = vmax.f32 %v1123_v61, %v1124_v63 }
 0x526   :  { %v1112_v7 = vrot.slane %v1111_v1, 1  ;;  %v1132_v2 = vmax.f32 %v1130_v59, %v1131_v51 }
 0x527   :  { %v1119_v14 = vrot.slane %v1118_v8, 1  ;;  %v1126_v5 = vrot.slane %v1125_v0, 1 }
 0x528   :  { %v1113_v32 = vmax.f32 %v1111_v1, %v1112_v7  ;;  %v1133_v15 = vrot.slane %v1132_v2, 1 }
 0x529   :  { %v1120_v9 = vmax.f32 %v1118_v8, %v1119_v14  ;;  %v1127_v24 = vmax.f32 %v1125_v0, %v1126_v5 }
 0x52a   :  { %v1135_v35 = vsub.f32 %v1031_v27, %v1113_v32  ;;  %v1134_v37 = vmax.f32 %v1132_v2, %v1133_v15 }
 0x52b   :  { %v1136_v43 = vsub.f32 %v1033_v20, %v1120_v9  ;;  %v1137_v39 = vsub.f32 %v1102_v13, %v1127_v24 }
 0x52c   :  { %v1139_v46 = vmul.f32 1.442695, %v1135_v35  ;;  %v1138_v18 = vsub.f32 %v1104_v4, %v1134_v37 }
 0x52d   :  { %v1141_v48 = vmul.f32 1.442695, %v1136_v43  ;;  %v1143_v38 = vmul.f32 1.442695, %v1137_v39 }
 0x52e   :  { %1375 = vpow2.f32 %v1139_v46  ;;  %v1145_v50 = vmul.f32 1.442695, %v1138_v18 }
 0x52f   :  { %1377 = vpow2.f32 %v1141_v48 }
 0x530   :  { %1379 = vpow2.f32 %v1143_v38 }
 0x531   :  { %1381 = vpow2.f32 %v1145_v50 }
 0x538   :  { %v1376_v36 = vpop.eup %1375 }
 0x539   :  { %v1378_v40 = vpop.eup %1377  ;;  %v1147_v45 = vsel %vm1106_vm10, %v1376_v36, 0.0 }
 0x53a   :  { %v1380_v22 = vpop.eup %1379  ;;  %v1148_v30 = vrot.slane %v1147_v45, 4  ;;  %v1154_v44 = vsel %vm1106_vm10, %v1378_v40, 0.0 }
 0x53b   :  { %v1382_v10 = vpop.eup %1381  ;;  %v1155_v29 = vrot.slane %v1154_v44, 4  ;;  %v1161_v53 = vsel %vm1106_vm10, %v1380_v22, 0.0 }
 0x53c   :  { %v1149_v47 = vadd.f32 %v1148_v30, %v1147_v45  ;;  %v1162_v42 = vrot.slane %v1161_v53, 4  ;;  %v1168_v33 = vsel %vm1106_vm10, %v1382_v10, 0.0 }
 0x53d   :  { %v1156_v26 = vadd.f32 %v1155_v29, %v1154_v44  ;;  %v1169_v60 = vrot.slane %v1168_v33, 4 }
 0x53e   :  { %v1150_v28 = vrot.slane %v1149_v47, 2  ;;  %v1163_v49 = vadd.f32 %v1162_v42, %v1161_v53 }
 0x53f   :  { %v1157_v52 = vrot.slane %v1156_v26, 2  ;;  %v1170_v54 = vadd.f32 %v1169_v60, %v1168_v33 }
 0x540   :  { %v1164_v55 = vrot.slane %v1163_v49, 2  ;;  %v1151_v11 = vadd.f32 %v1150_v28, %v1149_v47 }
 0x541   :  { %v1158_v17 = vadd.f32 %v1157_v52, %v1156_v26  ;;  %v1171_v27 = vrot.slane %v1170_v54, 2 }
 0x542   :  { %v1165_v12 = vadd.f32 %v1164_v55, %v1163_v49  ;;  %v1152_v21 = vrot.slane %v1151_v11, 1 }
 0x543   :  { %v1172_v20 = vadd.f32 %v1171_v27, %v1170_v54  ;;  %v1159_v13 = vrot.slane %v1158_v17, 1 }
 0x544   :  { %v1153_v3 = vadd.f32 %v1152_v21, %v1151_v11  ;;  %v1166_v19 = vrot.slane %v1165_v12, 1 }
 0x545   :  { %v1160_v4 = vadd.f32 %v1159_v13, %v1158_v17  ;;  %v1173_v34 = vrot.slane %v1172_v20, 1 }
 0x546   :  { %v1167_v41 = vadd.f32 %v1166_v19, %v1165_v12  ;;  %1383 = vrcp.f32 %v1153_v3 }
 0x547   :  { %v1174_v16 = vadd.f32 %v1173_v34, %v1172_v20  ;;  %1385 = vrcp.f32 %v1160_v4 }
 0x548   :  { %1387 = vrcp.f32 %v1167_v41 }
 0x549   :  { %1389 = vrcp.f32 %v1174_v16 }
 0x550   :  { %v1384_v25 = vpop.eup %1383 }
 0x551   :  { %v1386_v56 = vpop.eup %1385  ;;  %v1179_v23 = vmul.f32 %v1384_v25, %v1153_v3 }
 0x552   :  { %v1388_v6 = vpop.eup %1387  ;;  %v1180_v58 = vmul.f32 %v1386_v56, %v1160_v4 }
 0x553   :  { %v1390_v31 = vpop.eup %1389  ;;  %v1181_v61 = vmul.f32 %v1388_v6, %v1167_v41  ;;  %v1183_v57 = vsub.f32 2.0, %v1179_v23 }
 0x554   :  { %v1182_v59 = vmul.f32 %v1390_v31, %v1174_v16  ;;  %v1184_v62 = vsub.f32 2.0, %v1180_v58 }
 0x555   :  { %v1185_v63 = vsub.f32 2.0, %v1181_v61  ;;  %v1187_v1 = vmul.f32 %v1384_v25, %v1183_v57 }
 0x556   :  { %v1186_v51 = vsub.f32 2.0, %v1182_v59  ;;  %v1188_v8 = vmul.f32 %v1386_v56, %v1184_v62 }
 0x557   :  { %v1189_v0 = vmul.f32 %v1388_v6, %v1185_v63  ;;  %v1191_v7 = vmul.f32 %v1376_v36, %v1187_v1 }
 0x558   :  { %v1190_v2 = vmul.f32 %v1390_v31, %v1186_v51  ;;  %v1192_v14 = vmul.f32 %v1378_v40, %v1188_v8 }
 0x559   :  { %v1193_v5 = vmul.f32 %v1380_v22, %v1189_v0  ;;  %1195 = vst [vmem:[#allocation8] sm:$0xff] %v1191_v7 }
 0x55a   :  { %v1194_v32 = vmul.f32 %v1382_v10, %v1190_v2  ;;  %1196 = vst [vmem:[#allocation8 + $0x8] sm:$0xff] %v1192_v14 }
 0x55b   :  { %1197 = vst [vmem:[#allocation8 + $0x10] sm:$0xff] %v1193_v5 }
 0x55c   :  { %1198 = vst [vmem:[#allocation8 + $0x18] sm:$0xff] %v1194_v32 }
 0x55d   :  { %1475 = shalt.err (!%p1472_p0)
}
 0x55e   :  { %s1476_s12 = scalar_lea.hbm %s2407_s9, 512 }
 0x55f   :  { %p1477_p1 = scmp.ne.s32.totalorder %s2407_s9, %s1476_s12  ;;  %p1480_p2 = scmp.lt.u32.totalorder %s1476_s12, %s2407_s9 }
 0x561   :  { %p1482_p3 = pnand %p1480_p2, %p1477_p1 }
 0x563   :  { %1485 = shalt.err (!%p1482_p3)
}
 0x564   :  { %1208 = dma.vmem_to_hbm [thread:$0]  %s1206_s19, 512, %s2407_s9, [#allocation4]  }
 0x565   :  { %1490 = dma.done.wait [#allocation4], 512  }
 0x566   :  { %1491 = vsyncadd [#allocation4], 4294966784 }
 0x567   :  { %1212 = vsyncpa [#allocation3], 1 }
 0x568   :  { %1213 = vsyncpa [#allocation6], 1 }
 0x569   :  { %1214 = vsyncpa [#allocation4], 1 }

</bundles_post_ra>
